<compile_context>
chip_gen: v5e
topology: v5e:2x2
jax: 0.10.0
libtpu: 0.0.40
codegen_flags: <defaults>
</compile_context>

<pallas_src>
import functools

import jax
import jax.numpy as jnp
from jax import lax
from jax.experimental import pallas as pl
from jax.experimental.pallas import tpu as pltpu


def _round_up(x, m):
    return (x + m - 1) // m * m


def _dwconv_kernel(x_hbm_ref, wd_ref, b1_ref, wp_ref, b2_ref, o_ref,
                   xbuf, sem, *, ksize, stride):
    """Grid: (batch, h_tiles). One `tile_h`-row output slab per step.

    x_hbm_ref : (N, Hp, Wp, Cin_p)   padded NHWC input, left in HBM (pl.ANY)
    wd_ref    : (K, K, Cin_p)        depthwise weights, BN1 scale pre-folded
    b1_ref    : (1, Cin_p)           BN1 folded bias
    wp_ref    : (Cin_p, Cout_p)      1x1 weights (bf16), BN2 scale pre-folded
    b2_ref    : (1, Cout_p)          BN2 folded bias
    o_ref     : (1, tile_h, Wo, Cout_p)
    xbuf      : (2, th_in, Wp, Cin_p) VMEM double buffer for the input halo
    sem       : (2,) DMA semaphores, one per buffer slot
    """
    b = pl.program_id(0)
    t = pl.program_id(1)
    n_t = pl.num_programs(1)

    tile_h, wo, cout_p = o_ref.shape[1], o_ref.shape[2], o_ref.shape[3]
    th_in, _, cin_p = xbuf.shape[1], xbuf.shape[2], xbuf.shape[3]

    def copy_tile(t_idx, slot_idx):
        start = t_idx * (tile_h * stride)
        return pltpu.make_async_copy(
            x_hbm_ref.at[b, pl.ds(start, th_in)],
            xbuf.at[slot_idx],
            sem.at[slot_idx])

    slot = t % 2

    # First row-tile of each image: nothing was prefetched yet, fetch it now.
    @pl.when(t == 0)
    def _():
        copy_tile(t, slot).start()

    copy_tile(t, slot).wait()

    # Prefetch the next row-tile's halo window while computing this one.
    # (t is an "arbitrary" grid axis -> sequential per core, so the chain
    #  start@t -> wait@t+1 is always on the same core and same batch.)
    @pl.when(t + 1 < n_t)
    def _():
        copy_tile(t + 1, (t + 1) % 2).start()

    x = xbuf[slot]                         # (th_in, Wp, Cin_p) f32
    wd = wd_ref[...]                       # (K, K, Cin_p)

    # --- depthwise conv: hoist the (sublane-axis) W slices out of the kh
    #     loop -> K strided W slices, then cheap H-offset slices per tap. ---
    w_cols = []
    for kw in range(ksize):
        w_cols.append(lax.slice(
            x, (0, kw, 0),
            (th_in, kw + (wo - 1) * stride + 1, cin_p),
            (1, stride, 1)))               # (th_in, Wo, Cin_p)

    acc = jnp.zeros((tile_h, wo, cin_p), jnp.float32)
    for kh in range(ksize):
        h_hi = kh + (tile_h - 1) * stride + 1
        for kw in range(ksize):
            xs = lax.slice(w_cols[kw], (kh, 0, 0), (h_hi, wo, cin_p),
                           (stride, 1, 1))  # (tile_h, Wo, Cin_p)
            acc = acc + xs * wd[kh, kw, :]

    # --- BN1 bias (scale already folded into wd) + SiLU, f32 on VPU/EUP ---
    y1 = acc + b1_ref[...]
    y1 = y1 * jax.nn.sigmoid(y1)

    # --- pointwise 1x1 conv on the MXU (bf16 feed, f32 accumulate) ---
    y1m = y1.reshape(tile_h * wo, cin_p).astype(wp_ref.dtype)
    z = jnp.dot(y1m, wp_ref[...], preferred_element_type=jnp.float32)

    # --- BN2 bias (scale already folded into wp) + SiLU ---
    z = z + b2_ref[...]
    z = z * jax.nn.sigmoid(z)

    o_ref[0] = z.reshape(tile_h, wo, cout_p).astype(o_ref.dtype)


def _pick_tile_h(ho, wo, wp_pad, cin_p, cout_p, ksize, stride,
                 target=16, budget_bytes=8 << 20):
    """Largest divisor of Ho <= target whose double-buffered footprint fits."""
    def vmem_use(th):
        th_in = (th - 1) * stride + ksize
        return (2 * th_in * wp_pad * cin_p + 2 * th * wo * cout_p) * 4
    th = max(1, min(target, ho))
    while th > 1 and vmem_use(th) > budget_bytes:
        th -= 1
    while th > 1 and ho % th != 0:
        th -= 1
    return th


def dwconv_pallas(x_nchw, wd_oihw, bn1, wp_oihw, bn2, *, ksize, stride,
                  eps=1e-5, tile_h=None, mxu_dtype=jnp.bfloat16):
    """DWConv forward. x_nchw: (N, Cin, H, W) float32."""
    n, cin, h, w = x_nchw.shape
    cout = wp_oihw.shape[0]
    pad = (ksize - 1) // 2
    ho = (h + 2 * pad - ksize) // stride + 1
    wo = (w + 2 * pad - ksize) // stride + 1

    # Lane-dense channel padding (multiples of 128): unmasked stores,
    # full vreg occupancy, 128-wide MXU matmul. Padded channels stay 0.
    cin_p = _round_up(cin, 128)
    cout_p = _round_up(cout, 128)

    # Fold BN (inference mode): scale goes into the weights, bias stays.
    g1, be1, m1, v1 = bn1
    g2, be2, m2, v2 = bn2
    s1 = g1 / jnp.sqrt(v1 + eps)
    b1 = be1 - m1 * s1
    s2 = g2 / jnp.sqrt(v2 + eps)
    b2 = be2 - m2 * s2

    # Layout glue: NCHW -> NHWC, pad H/W halo + channels once. The kernel's
    # manual halo DMA then always reads in-bounds rows.
    x_nhwc = jnp.transpose(x_nchw, (0, 2, 3, 1))
    xpad = jnp.pad(x_nhwc, ((0, 0), (pad, pad), (pad, pad), (0, cin_p - cin)))
    wp_pad = xpad.shape[2]

    # Weights: depthwise (K,K,Cin_p) with BN1 scale folded (f32);
    # pointwise (Cin_p,Cout_p) with BN2 scale folded, cast for the MXU.
    wd_hwc = jnp.transpose(wd_oihw[:, 0, :, :], (1, 2, 0)) * s1[None, None, :]
    wd_hwc = jnp.pad(wd_hwc, ((0, 0), (0, 0), (0, cin_p - cin))).astype(jnp.float32)
    wp_mat = jnp.transpose(wp_oihw[:, :, 0, 0], (1, 0)) * s2[None, :]
    wp_mat = jnp.pad(wp_mat, ((0, cin_p - cin), (0, cout_p - cout))).astype(mxu_dtype)

    b1_2d = jnp.pad(b1, (0, cin_p - cin)).reshape(1, cin_p).astype(jnp.float32)
    b2_2d = jnp.pad(b2, (0, cout_p - cout)).reshape(1, cout_p).astype(jnp.float32)

    if tile_h is None:
        tile_h = _pick_tile_h(ho, wo, wp_pad, cin_p, cout_p, ksize, stride)
    assert ho % tile_h == 0, (ho, tile_h)
    n_t = ho // tile_h
    th_in = (tile_h - 1) * stride + ksize   # halo window rows per tile

    kernel = functools.partial(_dwconv_kernel, ksize=ksize, stride=stride)

    out_nhwc = pl.pallas_call(
        kernel,
        out_shape=jax.ShapeDtypeStruct((n, ho, wo, cout_p), x_nchw.dtype),
        grid_spec=pltpu.PrefetchScalarGridSpec(
            num_scalar_prefetch=0,
            grid=(n, n_t),
            in_specs=[
                pl.BlockSpec(memory_space=pl.ANY),              # input stays in HBM
                pl.BlockSpec((ksize, ksize, cin_p), lambda b, t: (0, 0, 0)),
                pl.BlockSpec((1, cin_p), lambda b, t: (0, 0)),
                pl.BlockSpec((cin_p, cout_p), lambda b, t: (0, 0)),
                pl.BlockSpec((1, cout_p), lambda b, t: (0, 0)),
            ],
            out_specs=pl.BlockSpec((1, tile_h, wo, cout_p),
                                   lambda b, t: (b, t, 0, 0)),
            scratch_shapes=[
                pltpu.VMEM((2, th_in, wp_pad, cin_p), jnp.float32),
                pltpu.SemaphoreType.DMA((2,)),
            ]),
        compiler_params=pltpu.CompilerParams(
            dimension_semantics=("parallel", "arbitrary"),
            vmem_limit_bytes=32 * 1024 * 1024),
    )(xpad, wd_hwc, b1_2d, wp_mat, b2_2d)

    # Drop channel padding; layout back NHWC -> NCHW.
    return jnp.transpose(out_nhwc[..., :cout], (0, 3, 1, 2))


def dwconv_reference(x_nchw, wd_oihw, bn1, wp_oihw, bn2, *, ksize, stride, eps=1e-5):
    """Plain-JAX reference matching PyTorch (eval-mode BN) semantics."""
    cin = x_nchw.shape[1]
    pad = (ksize - 1) // 2
    g1, be1, m1, v1 = bn1
    g2, be2, m2, v2 = bn2

    y = lax.conv_general_dilated(
        x_nchw, wd_oihw, window_strides=(stride, stride),
        padding=[(pad, pad), (pad, pad)], feature_group_count=cin,
        dimension_numbers=("NCHW", "OIHW", "NCHW"))
    y = (y - m1[None, :, None, None]) / jnp.sqrt(v1[None, :, None, None] + eps)
    y = y * g1[None, :, None, None] + be1[None, :, None, None]
    y = y * jax.nn.sigmoid(y)

    z = lax.conv_general_dilated(
        y, wp_oihw, window_strides=(1, 1), padding=[(0, 0), (0, 0)],
        dimension_numbers=("NCHW", "OIHW", "NCHW"))
    z = (z - m2[None, :, None, None]) / jnp.sqrt(v2[None, :, None, None] + eps)
    z = z * g2[None, :, None, None] + be2[None, :, None, None]
    z = z * jax.nn.sigmoid(z)
    return z


if __name__ == "__main__":
    # Small config consistent with DWConv(in_channels=4, out_channels=8, ksize=3)
    N, CIN, COUT, H, W = 2, 4, 8, 16, 16
    KSIZE, STRIDE = 3, 1

    key = jax.random.PRNGKey(0)
    keys = jax.random.split(key, 10)

    x = jax.random.normal(keys[0], (N, CIN, H, W), jnp.float32)

    # Depthwise conv weight: (in_channels, 1, K, K)  (groups=in_channels, bias=False)
    wd = jax.random.normal(keys[1], (CIN, 1, KSIZE, KSIZE), jnp.float32) * 0.2
    # Pointwise conv weight: (out_channels, in_channels, 1, 1)
    wp = jax.random.normal(keys[2], (COUT, CIN, 1, 1), jnp.float32) * 0.2

    # BatchNorm params (inference mode): gamma, beta, running_mean, running_var
    bn1 = (jax.random.normal(keys[3], (CIN,), jnp.float32) * 0.1 + 1.0,
           jax.random.normal(keys[4], (CIN,), jnp.float32) * 0.1,
           jax.random.normal(keys[5], (CIN,), jnp.float32) * 0.1,
           jax.random.uniform(keys[6], (CIN,), jnp.float32, 0.5, 1.5))
    bn2 = (jax.random.normal(keys[7], (COUT,), jnp.float32) * 0.1 + 1.0,
           jax.random.normal(keys[8], (COUT,), jnp.float32) * 0.1,
           jax.random.normal(keys[9], (COUT,), jnp.float32) * 0.1,
           jax.random.uniform(keys[0], (COUT,), jnp.float32, 0.5, 1.5))

    ref = jax.block_until_ready(
        dwconv_reference(x, wd, bn1, wp, bn2, ksize=KSIZE, stride=STRIDE))

    # f32 MXU feed: tight check of kernel structure (tiling, halo DMA, padding).
    out_f32 = dwconv_pallas(x, wd, bn1, wp, bn2, ksize=KSIZE, stride=STRIDE,
                            tile_h=8, mxu_dtype=jnp.float32)
    out_f32 = jax.block_until_ready(out_f32)
    assert out_f32.shape == (N, COUT, H, W), out_f32.shape
    assert jnp.allclose(out_f32, ref, atol=1e-4, rtol=1e-4), \
        float(jnp.max(jnp.abs(out_f32 - ref)))

    # bf16 MXU feed (default; v6e/v7x fast path): looser tolerance for bf16 rounding.
    out_bf16 = dwconv_pallas(x, wd, bn1, wp, bn2, ksize=KSIZE, stride=STRIDE,
                             tile_h=8)
    out_bf16 = jax.block_until_ready(out_bf16)
    assert out_bf16.shape == (N, COUT, H, W), out_bf16.shape
    assert jnp.allclose(out_bf16, ref, atol=2e-2, rtol=2e-2), \
        float(jnp.max(jnp.abs(out_bf16 - ref)))

    print("KERNEL_OK")
</pallas_src>

<mosaic_0001>
module attributes {stable_mosaic.version = 11 : i64} {
  func.func @_dwconv_kernel(%arg0: i32, %arg1: i32, %arg2: memref<2x18x18x128xf32, #tpu.memory_space<any>>, %arg3: memref<3x3x128xf32, #tpu.memory_space<vmem>>, %arg4: memref<1x128xf32, #tpu.memory_space<vmem>>, %arg5: memref<128x128xf32, #tpu.memory_space<vmem>>, %arg6: memref<1x128xf32, #tpu.memory_space<vmem>>, %arg7: memref<1x8x16x128xf32, #tpu.memory_space<vmem>>, %arg8: memref<2x10x18x128xf32, #tpu.memory_space<vmem>>, %arg9: memref<2x!tpu.dma_semaphore, #tpu.memory_space<semaphore_mem>>) attributes {dimension_semantics = [#tpu.dimension_semantics<parallel>, #tpu.dimension_semantics<arbitrary>], iteration_bounds = array<i64: 2, 2>, scalar_prefetch = 0 : i64, scratch_operands = 2 : i64, tpu.core_type = #tpu.core_type<tc>, window_params = [{}, {pipeline_mode = #tpu.pipeline_mode<synchronous>, transform_indices = @transform_1, window_bounds = array<i64: 3, 3, 128>}, {pipeline_mode = #tpu.pipeline_mode<synchronous>, transform_indices = @transform_2, window_bounds = array<i64: 1, 128>}, {pipeline_mode = #tpu.pipeline_mode<synchronous>, transform_indices = @transform_3, window_bounds = array<i64: 128, 128>}, {pipeline_mode = #tpu.pipeline_mode<synchronous>, transform_indices = @transform_4, window_bounds = array<i64: 1, 128>}, {transform_indices = @transform_5, window_bounds = array<i64: 1, 8, 16, 128>}]} {
    %c2_i32 = arith.constant 2 : i32
    %c0_i32 = arith.constant 0 : i32
    %0 = arith.cmpi eq, %c2_i32, %c0_i32 : i32
    %c1_i32 = arith.constant 1 : i32
    %1 = arith.select %0, %c1_i32, %c2_i32 : i32
    %2 = arith.remsi %arg1, %1 : i32
    %c0_i32_0 = arith.constant 0 : i32
    %3 = arith.cmpi ne, %2, %c0_i32_0 : i32
    %c0_i32_1 = arith.constant 0 : i32
    %4 = arith.cmpi slt, %2, %c0_i32_1 : i32
    %c0_i32_2 = arith.constant 0 : i32
    %5 = arith.cmpi slt, %1, %c0_i32_2 : i32
    %6 = arith.xori %4, %5 : i1
    %7 = arith.andi %6, %3 : i1
    %8 = arith.addi %2, %1 : i32
    %9 = arith.select %7, %8, %2 : i32
    %c0_i32_3 = arith.constant 0 : i32
    %10 = arith.cmpi eq, %arg1, %c0_i32_3 : i32
    %11 = arith.extui %10 : i1 to i32
    %c0_i32_4 = arith.constant 0 : i32
    %12 = arith.cmpi ne, %11, %c0_i32_4 : i32
    scf.if %12 {
      %c8_i32_31 = arith.constant 8 : i32
      %121 = arith.muli %arg1, %c8_i32_31 : i32
      %c0_i32_32 = arith.constant 0 : i32
      %c0_i32_33 = arith.constant 0 : i32
      %122 = tpu.memref_slice %arg2[%arg0, %121, %c0_i32_32, %c0_i32_33] : memref<2x18x18x128xf32, #tpu.memory_space<any>> -> memref<1x10x18x128xf32, #tpu.memory_space<any>>
      %123 = tpu.memref_squeeze %122 : memref<1x10x18x128xf32, #tpu.memory_space<any>> -> memref<10x18x128xf32, #tpu.memory_space<any>>
      %c0_i32_34 = arith.constant 0 : i32
      %c0_i32_35 = arith.constant 0 : i32
      %c0_i32_36 = arith.constant 0 : i32
      %124 = tpu.memref_slice %arg8[%9, %c0_i32_34, %c0_i32_35, %c0_i32_36] : memref<2x10x18x128xf32, #tpu.memory_space<vmem>> -> memref<1x10x18x128xf32, #tpu.memory_space<vmem>>
      %125 = tpu.memref_squeeze %124 : memref<1x10x18x128xf32, #tpu.memory_space<vmem>> -> memref<10x18x128xf32, #tpu.memory_space<vmem>>
      %126 = tpu.memref_slice %arg9[%9] : memref<2x!tpu.dma_semaphore, #tpu.memory_space<semaphore_mem>> -> memref<1x!tpu.dma_semaphore, #tpu.memory_space<semaphore_mem>>
      %127 = tpu.memref_squeeze %126 : memref<1x!tpu.dma_semaphore, #tpu.memory_space<semaphore_mem>> -> memref<!tpu.dma_semaphore, #tpu.memory_space<semaphore_mem>>
      tpu.enqueue_dma source(%123 : memref<10x18x128xf32, #tpu.memory_space<any>>) target(%125 : memref<10x18x128xf32, #tpu.memory_space<vmem>>) target_semaphore(%127 : memref<!tpu.dma_semaphore, #tpu.memory_space<semaphore_mem>>)
    } else {
    }
    %c8_i32 = arith.constant 8 : i32
    %13 = arith.muli %arg1, %c8_i32 : i32
    %c0_i32_5 = arith.constant 0 : i32
    %c0_i32_6 = arith.constant 0 : i32
    %14 = tpu.memref_slice %arg2[%arg0, %13, %c0_i32_5, %c0_i32_6] : memref<2x18x18x128xf32, #tpu.memory_space<any>> -> memref<1x10x18x128xf32, #tpu.memory_space<any>>
    %15 = tpu.memref_squeeze %14 : memref<1x10x18x128xf32, #tpu.memory_space<any>> -> memref<10x18x128xf32, #tpu.memory_space<any>>
    %c0_i32_7 = arith.constant 0 : i32
    %c0_i32_8 = arith.constant 0 : i32
    %c0_i32_9 = arith.constant 0 : i32
    %16 = tpu.memref_slice %arg8[%9, %c0_i32_7, %c0_i32_8, %c0_i32_9] : memref<2x10x18x128xf32, #tpu.memory_space<vmem>> -> memref<1x10x18x128xf32, #tpu.memory_space<vmem>>
    %17 = tpu.memref_squeeze %16 : memref<1x10x18x128xf32, #tpu.memory_space<vmem>> -> memref<10x18x128xf32, #tpu.memory_space<vmem>>
    %18 = tpu.memref_slice %arg9[%9] : memref<2x!tpu.dma_semaphore, #tpu.memory_space<semaphore_mem>> -> memref<1x!tpu.dma_semaphore, #tpu.memory_space<semaphore_mem>>
    %19 = tpu.memref_squeeze %18 : memref<1x!tpu.dma_semaphore, #tpu.memory_space<semaphore_mem>> -> memref<!tpu.dma_semaphore, #tpu.memory_space<semaphore_mem>>
    tpu.wait_dma2 semaphore(%19 : memref<!tpu.dma_semaphore, #tpu.memory_space<semaphore_mem>>) src(%15 : memref<10x18x128xf32, #tpu.memory_space<any>>) dst(%17 : memref<10x18x128xf32, #tpu.memory_space<vmem>>)
    %c1_i32_10 = arith.constant 1 : i32
    %20 = arith.addi %arg1, %c1_i32_10 : i32
    %c2_i32_11 = arith.constant 2 : i32
    %21 = arith.cmpi slt, %20, %c2_i32_11 : i32
    %22 = arith.extui %21 : i1 to i32
    %c0_i32_12 = arith.constant 0 : i32
    %23 = arith.cmpi ne, %22, %c0_i32_12 : i32
    scf.if %23 {
      %c1_i32_31 = arith.constant 1 : i32
      %121 = arith.addi %arg1, %c1_i32_31 : i32
      %c1_i32_32 = arith.constant 1 : i32
      %122 = arith.addi %arg1, %c1_i32_32 : i32
      %c2_i32_33 = arith.constant 2 : i32
      %c0_i32_34 = arith.constant 0 : i32
      %123 = arith.cmpi eq, %c2_i32_33, %c0_i32_34 : i32
      %c1_i32_35 = arith.constant 1 : i32
      %124 = arith.select %123, %c1_i32_35, %c2_i32_33 : i32
      %125 = arith.remsi %122, %124 : i32
      %c0_i32_36 = arith.constant 0 : i32
      %126 = arith.cmpi ne, %125, %c0_i32_36 : i32
      %c0_i32_37 = arith.constant 0 : i32
      %127 = arith.cmpi slt, %125, %c0_i32_37 : i32
      %c0_i32_38 = arith.constant 0 : i32
      %128 = arith.cmpi slt, %124, %c0_i32_38 : i32
      %129 = arith.xori %127, %128 : i1
      %130 = arith.andi %129, %126 : i1
      %131 = arith.addi %125, %124 : i32
      %132 = arith.select %130, %131, %125 : i32
      %c8_i32_39 = arith.constant 8 : i32
      %133 = arith.muli %121, %c8_i32_39 : i32
      %c0_i32_40 = arith.constant 0 : i32
      %c0_i32_41 = arith.constant 0 : i32
      %134 = tpu.memref_slice %arg2[%arg0, %133, %c0_i32_40, %c0_i32_41] : memref<2x18x18x128xf32, #tpu.memory_space<any>> -> memref<1x10x18x128xf32, #tpu.memory_space<any>>
      %135 = tpu.memref_squeeze %134 : memref<1x10x18x128xf32, #tpu.memory_space<any>> -> memref<10x18x128xf32, #tpu.memory_space<any>>
      %c0_i32_42 = arith.constant 0 : i32
      %c0_i32_43 = arith.constant 0 : i32
      %c0_i32_44 = arith.constant 0 : i32
      %136 = tpu.memref_slice %arg8[%132, %c0_i32_42, %c0_i32_43, %c0_i32_44] : memref<2x10x18x128xf32, #tpu.memory_space<vmem>> -> memref<1x10x18x128xf32, #tpu.memory_space<vmem>>
      %137 = tpu.memref_squeeze %136 : memref<1x10x18x128xf32, #tpu.memory_space<vmem>> -> memref<10x18x128xf32, #tpu.memory_space<vmem>>
      %138 = tpu.memref_slice %arg9[%132] : memref<2x!tpu.dma_semaphore, #tpu.memory_space<semaphore_mem>> -> memref<1x!tpu.dma_semaphore, #tpu.memory_space<semaphore_mem>>
      %139 = tpu.memref_squeeze %138 : memref<1x!tpu.dma_semaphore, #tpu.memory_space<semaphore_mem>> -> memref<!tpu.dma_semaphore, #tpu.memory_space<semaphore_mem>>
      tpu.enqueue_dma source(%135 : memref<10x18x128xf32, #tpu.memory_space<any>>) target(%137 : memref<10x18x128xf32, #tpu.memory_space<vmem>>) target_semaphore(%139 : memref<!tpu.dma_semaphore, #tpu.memory_space<semaphore_mem>>)
    } else {
    }
    %24 = arith.index_cast %9 : i32 to index
    %c0 = arith.constant 0 : index
    %c0_13 = arith.constant 0 : index
    %c0_14 = arith.constant 0 : index
    %25 = vector.load %arg8[%24, %c0, %c0_13, %c0_14] : memref<2x10x18x128xf32, #tpu.memory_space<vmem>>, vector<1x10x18x128xf32>
    %26 = vector.shape_cast %25 : vector<1x10x18x128xf32> to vector<10x18x128xf32>
    %c0_15 = arith.constant 0 : index
    %c0_16 = arith.constant 0 : index
    %c0_17 = arith.constant 0 : index
    %27 = vector.load %arg3[%c0_15, %c0_16, %c0_17] : memref<3x3x128xf32, #tpu.memory_space<vmem>>, vector<3x3x128xf32>
    %28 = vector.extract_strided_slice %26 {offsets = [0, 0, 0], sizes = [10, 16, 128], strides = [1, 1, 1]} : vector<10x18x128xf32> to vector<10x16x128xf32>
    %29 = vector.extract_strided_slice %26 {offsets = [0, 1, 0], sizes = [10, 16, 128], strides = [1, 1, 1]} : vector<10x18x128xf32> to vector<10x16x128xf32>
    %30 = vector.extract_strided_slice %26 {offsets = [0, 2, 0], sizes = [10, 16, 128], strides = [1, 1, 1]} : vector<10x18x128xf32> to vector<10x16x128xf32>
    %cst = arith.constant 0.000000e+00 : f32
    %31 = vector.broadcast %cst : f32 to vector<8x16x128xf32>
    %32 = vector.extract_strided_slice %28 {offsets = [0, 0, 0], sizes = [8, 16, 128], strides = [1, 1, 1]} : vector<10x16x128xf32> to vector<8x16x128xf32>
    %33 = vector.extract_strided_slice %27 {offsets = [0, 0, 0], sizes = [1, 1, 128], strides = [1, 1, 1]} : vector<3x3x128xf32> to vector<1x1x128xf32>
    %34 = vector.shape_cast %33 : vector<1x1x128xf32> to vector<128xf32>
    %35 = vector.shape_cast %34 : vector<128xf32> to vector<1x1x128xf32>
    %36 = vector.broadcast %35 : vector<1x1x128xf32> to vector<8x16x128xf32>
    %37 = arith.mulf %32, %36 : vector<8x16x128xf32>
    %38 = arith.addf %31, %37 : vector<8x16x128xf32>
    %39 = vector.extract_strided_slice %29 {offsets = [0, 0, 0], sizes = [8, 16, 128], strides = [1, 1, 1]} : vector<10x16x128xf32> to vector<8x16x128xf32>
    %40 = vector.extract_strided_slice %27 {offsets = [0, 1, 0], sizes = [1, 1, 128], strides = [1, 1, 1]} : vector<3x3x128xf32> to vector<1x1x128xf32>
    %41 = vector.shape_cast %40 : vector<1x1x128xf32> to vector<128xf32>
    %42 = vector.shape_cast %41 : vector<128xf32> to vector<1x1x128xf32>
    %43 = vector.broadcast %42 : vector<1x1x128xf32> to vector<8x16x128xf32>
    %44 = arith.mulf %39, %43 : vector<8x16x128xf32>
    %45 = arith.addf %38, %44 : vector<8x16x128xf32>
    %46 = vector.extract_strided_slice %30 {offsets = [0, 0, 0], sizes = [8, 16, 128], strides = [1, 1, 1]} : vector<10x16x128xf32> to vector<8x16x128xf32>
    %47 = vector.extract_strided_slice %27 {offsets = [0, 2, 0], sizes = [1, 1, 128], strides = [1, 1, 1]} : vector<3x3x128xf32> to vector<1x1x128xf32>
    %48 = vector.shape_cast %47 : vector<1x1x128xf32> to vector<128xf32>
    %49 = vector.shape_cast %48 : vector<128xf32> to vector<1x1x128xf32>
    %50 = vector.broadcast %49 : vector<1x1x128xf32> to vector<8x16x128xf32>
    %51 = arith.mulf %46, %50 : vector<8x16x128xf32>
    %52 = arith.addf %45, %51 : vector<8x16x128xf32>
    %53 = vector.extract_strided_slice %28 {offsets = [1, 0, 0], sizes = [8, 16, 128], strides = [1, 1, 1]} : vector<10x16x128xf32> to vector<8x16x128xf32>
    %54 = vector.extract_strided_slice %27 {offsets = [1, 0, 0], sizes = [1, 1, 128], strides = [1, 1, 1]} : vector<3x3x128xf32> to vector<1x1x128xf32>
    %55 = vector.shape_cast %54 : vector<1x1x128xf32> to vector<128xf32>
    %56 = vector.shape_cast %55 : vector<128xf32> to vector<1x1x128xf32>
    %57 = vector.broadcast %56 : vector<1x1x128xf32> to vector<8x16x128xf32>
    %58 = arith.mulf %53, %57 : vector<8x16x128xf32>
    %59 = arith.addf %52, %58 : vector<8x16x128xf32>
    %60 = vector.extract_strided_slice %29 {offsets = [1, 0, 0], sizes = [8, 16, 128], strides = [1, 1, 1]} : vector<10x16x128xf32> to vector<8x16x128xf32>
    %61 = vector.extract_strided_slice %27 {offsets = [1, 1, 0], sizes = [1, 1, 128], strides = [1, 1, 1]} : vector<3x3x128xf32> to vector<1x1x128xf32>
    %62 = vector.shape_cast %61 : vector<1x1x128xf32> to vector<128xf32>
    %63 = vector.shape_cast %62 : vector<128xf32> to vector<1x1x128xf32>
    %64 = vector.broadcast %63 : vector<1x1x128xf32> to vector<8x16x128xf32>
    %65 = arith.mulf %60, %64 : vector<8x16x128xf32>
    %66 = arith.addf %59, %65 : vector<8x16x128xf32>
    %67 = vector.extract_strided_slice %30 {offsets = [1, 0, 0], sizes = [8, 16, 128], strides = [1, 1, 1]} : vector<10x16x128xf32> to vector<8x16x128xf32>
    %68 = vector.extract_strided_slice %27 {offsets = [1, 2, 0], sizes = [1, 1, 128], strides = [1, 1, 1]} : vector<3x3x128xf32> to vector<1x1x128xf32>
    %69 = vector.shape_cast %68 : vector<1x1x128xf32> to vector<128xf32>
    %70 = vector.shape_cast %69 : vector<128xf32> to vector<1x1x128xf32>
    %71 = vector.broadcast %70 : vector<1x1x128xf32> to vector<8x16x128xf32>
    %72 = arith.mulf %67, %71 : vector<8x16x128xf32>
    %73 = arith.addf %66, %72 : vector<8x16x128xf32>
    %74 = vector.extract_strided_slice %28 {offsets = [2, 0, 0], sizes = [8, 16, 128], strides = [1, 1, 1]} : vector<10x16x128xf32> to vector<8x16x128xf32>
    %75 = vector.extract_strided_slice %27 {offsets = [2, 0, 0], sizes = [1, 1, 128], strides = [1, 1, 1]} : vector<3x3x128xf32> to vector<1x1x128xf32>
    %76 = vector.shape_cast %75 : vector<1x1x128xf32> to vector<128xf32>
    %77 = vector.shape_cast %76 : vector<128xf32> to vector<1x1x128xf32>
    %78 = vector.broadcast %77 : vector<1x1x128xf32> to vector<8x16x128xf32>
    %79 = arith.mulf %74, %78 : vector<8x16x128xf32>
    %80 = arith.addf %73, %79 : vector<8x16x128xf32>
    %81 = vector.extract_strided_slice %29 {offsets = [2, 0, 0], sizes = [8, 16, 128], strides = [1, 1, 1]} : vector<10x16x128xf32> to vector<8x16x128xf32>
    %82 = vector.extract_strided_slice %27 {offsets = [2, 1, 0], sizes = [1, 1, 128], strides = [1, 1, 1]} : vector<3x3x128xf32> to vector<1x1x128xf32>
    %83 = vector.shape_cast %82 : vector<1x1x128xf32> to vector<128xf32>
    %84 = vector.shape_cast %83 : vector<128xf32> to vector<1x1x128xf32>
    %85 = vector.broadcast %84 : vector<1x1x128xf32> to vector<8x16x128xf32>
    %86 = arith.mulf %81, %85 : vector<8x16x128xf32>
    %87 = arith.addf %80, %86 : vector<8x16x128xf32>
    %88 = vector.extract_strided_slice %30 {offsets = [2, 0, 0], sizes = [8, 16, 128], strides = [1, 1, 1]} : vector<10x16x128xf32> to vector<8x16x128xf32>
    %89 = vector.extract_strided_slice %27 {offsets = [2, 2, 0], sizes = [1, 1, 128], strides = [1, 1, 1]} : vector<3x3x128xf32> to vector<1x1x128xf32>
    %90 = vector.shape_cast %89 : vector<1x1x128xf32> to vector<128xf32>
    %91 = vector.shape_cast %90 : vector<128xf32> to vector<1x1x128xf32>
    %92 = vector.broadcast %91 : vector<1x1x128xf32> to vector<8x16x128xf32>
    %93 = arith.mulf %88, %92 : vector<8x16x128xf32>
    %94 = arith.addf %87, %93 : vector<8x16x128xf32>
    %c0_18 = arith.constant 0 : index
    %c0_19 = arith.constant 0 : index
    %95 = vector.load %arg4[%c0_18, %c0_19] : memref<1x128xf32, #tpu.memory_space<vmem>>, vector<1x128xf32>
    %96 = vector.shape_cast %95 : vector<1x128xf32> to vector<1x1x128xf32>
    %97 = vector.broadcast %96 : vector<1x1x128xf32> to vector<8x16x128xf32>
    %98 = arith.addf %94, %97 : vector<8x16x128xf32>
    %99 = arith.negf %98 : vector<8x16x128xf32>
    %100 = math.exp %99 : vector<8x16x128xf32>
    %cst_20 = arith.constant 1.000000e+00 : f32
    %101 = vector.broadcast %cst_20 : f32 to vector<8x16x128xf32>
    %102 = arith.addf %101, %100 : vector<8x16x128xf32>
    %103 = arith.divf %101, %102 : vector<8x16x128xf32>
    %104 = arith.mulf %98, %103 : vector<8x16x128xf32>
    %105 = vector.shape_cast %104 : vector<8x16x128xf32> to vector<128x128xf32>
    %c0_21 = arith.constant 0 : index
    %c0_22 = arith.constant 0 : index
    %106 = vector.load %arg5[%c0_21, %c0_22] : memref<128x128xf32, #tpu.memory_space<vmem>>, vector<128x128xf32>
    %cst_23 = arith.constant dense<0.000000e+00> : vector<128x128xf32>
    %107 = tpu.matmul %105, %106, %cst_23 {dimension_numbers = #tpu.dot_dimension_numbers<[1], [0], [0], [1], [0, 0, 1, 1], [], []>} : vector<128x128xf32>, vector<128x128xf32>, vector<128x128xf32> -> vector<128x128xf32>
    %c0_24 = arith.constant 0 : index
    %c0_25 = arith.constant 0 : index
    %108 = vector.load %arg6[%c0_24, %c0_25] : memref<1x128xf32, #tpu.memory_space<vmem>>, vector<1x128xf32>
    %109 = vector.broadcast %108 : vector<1x128xf32> to vector<128x128xf32>
    %110 = arith.addf %107, %109 : vector<128x128xf32>
    %111 = arith.negf %110 : vector<128x128xf32>
    %112 = math.exp %111 : vector<128x128xf32>
    %cst_26 = arith.constant 1.000000e+00 : f32
    %113 = vector.broadcast %cst_26 : f32 to vector<128x128xf32>
    %114 = arith.addf %113, %112 : vector<128x128xf32>
    %115 = arith.divf %113, %114 : vector<128x128xf32>
    %116 = arith.mulf %110, %115 : vector<128x128xf32>
    %117 = vector.shape_cast %116 : vector<128x128xf32> to vector<8x16x128xf32>
    %c0_27 = arith.constant 0 : index
    %c0_28 = arith.constant 0 : index
    %c0_29 = arith.constant 0 : index
    %c0_30 = arith.constant 0 : index
    %118 = vector.load %arg7[%c0_27, %c0_28, %c0_29, %c0_30] : memref<1x8x16x128xf32, #tpu.memory_space<vmem>>, vector<1x8x16x128xf32>
    %119 = vector.shape_cast %118 : vector<1x8x16x128xf32> to vector<8x16x128xf32>
    %120 = vector.shape_cast %117 : vector<8x16x128xf32> to vector<1x8x16x128xf32>
    tpu.vector_store %arg7[%c0_27, %c0_28, %c0_29, %c0_30], %120 {strides = array<i32>} : memref<1x8x16x128xf32, #tpu.memory_space<vmem>>, vector<1x8x16x128xf32>,
    return
  }
  func.func @transform_1(%arg0: i32, %arg1: i32) -> (i32, i32, i32) {
    %c0_i32 = arith.constant 0 : i32
    %c0_i32_0 = arith.constant 0 : i32
    %c0_i32_1 = arith.constant 0 : i32
    %c0_i32_2 = arith.constant 0 : i32
    return %c0_i32, %c0_i32_0, %c0_i32_1 : i32, i32, i32
  }
  func.func @transform_2(%arg0: i32, %arg1: i32) -> (i32, i32) {
    %c0_i32 = arith.constant 0 : i32
    %c0_i32_0 = arith.constant 0 : i32
    %c0_i32_1 = arith.constant 0 : i32
    return %c0_i32, %c0_i32_0 : i32, i32
  }
  func.func @transform_3(%arg0: i32, %arg1: i32) -> (i32, i32) {
    %c0_i32 = arith.constant 0 : i32
    %c0_i32_0 = arith.constant 0 : i32
    %c0_i32_1 = arith.constant 0 : i32
    return %c0_i32, %c0_i32_0 : i32, i32
  }
  func.func @transform_4(%arg0: i32, %arg1: i32) -> (i32, i32) {
    %c0_i32 = arith.constant 0 : i32
    %c0_i32_0 = arith.constant 0 : i32
    %c0_i32_1 = arith.constant 0 : i32
    return %c0_i32, %c0_i32_0 : i32, i32
  }
  func.func @transform_5(%arg0: i32, %arg1: i32) -> (i32, i32, i32, i32) {
    %c0_i32 = arith.constant 0 : i32
    %c0_i32_0 = arith.constant 0 : i32
    %c0_i32_1 = arith.constant 0 : i32
    return %arg0, %arg1, %c0_i32, %c0_i32_0 : i32, i32, i32, i32
  }
}

</mosaic_0001>

<bundles_post_ra>
// kernel: tpu_custom_call.1
= control target key start
LH: loop header
LB: loop body
LE: loop exit
PB: predicated region body
PF: predicated region fallthrough
CT: control target
= control target key end

     0   :  { %10 = vsyncpa [#allocation5], 0  ;;  %s4322_s0 = inlined_call_operand.vmem [shape: f32[2,18,18,128], index: 0, kind: input, shape index: {}]   ;;  %s4323_s1 = inlined_call_operand.vmem [shape: f32[3,3,128], index: 1, kind: input, shape index: {}]   ;;  %s4324_s2 = inlined_call_operand.vmem [shape: f32[1,128], index: 2, kind: input, shape index: {}]   ;;  %s4325_s3 = inlined_call_operand.vmem [shape: f32[128,128], index: 3, kind: input, shape index: {}]   ;;  %s4326_s4 = inlined_call_operand.vmem [shape: f32[1,128], index: 4, kind: input, shape index: {}]   ;;  %s4327_s5 = inlined_call_operand.hbm [shape: f32[2,16,16,128], index: 5, kind: output, shape index: {}]  }
   0x1   :  { %12 = vsyncpa [#allocation5 + $0x1], 0  ;;  %s2679_s18 = smov 0   ;;  %s2681_s19 = smov 0  }
   0x2   :  { %s2683_s20 = smov 0   ;;  %s2685_s21 = smov 0  }
   0x3   :  { %s2687_s22 = smov 0   ;;  %s2689_s23 = smov 0  }
   0x4   :  { %s2691_s24 = smov 0   ;;  %s2693_s25 = smov 0  }
   0x5 LB: > { %s2172_s26 = sadd.s32 4294967295, %s2645_s25   ;;  %s2173_s27 = sadd.s32 4294967294, %s2645_s25   ;;  %s2645_s25 = sphi %s2693_s25, %s18_s25   ;;  %s2641_s24 = sphi %s2691_s24, %s4557_s24   ;;  %s2637_s23 = sphi %s2689_s23, %s4556_s23   ;;  %s2633_s22 = sphi %s2687_s22, %s4555_s22   ;;  %s2629_s21 = sphi %s2685_s21, %s4554_s21   ;;  %s2625_s20 = sphi %s2683_s20, %s4553_s20   ;;  %s2621_s19 = sphi %s2681_s19, %s4552_s19   ;;  %s2617_s18 = sphi %s2679_s18, %s4551_s18  }
   0x6   : > { %s27_s28 = sadd.s32 1, %s2637_s23  ;;  %s30_s29 = sadd.s32 1, %s2641_s24 }
   0x7   : > { %p28_p0 = scmp.ge.s32.totalorder %s27_s28, 2  ;;  %p133_p1 = scmp.ne.s32.totalorder %s2625_s20, %s2621_s19 }
   0x8   : > { %p134_p2 = scmp.eq.s32.totalorder %s2172_s26, 3  ;;  %p139_p5 = scmp.ne.s32.totalorder %s2621_s19, %s2617_s18 }
   0x9   : > { %s4559_s28 = smov (%p28_p0, %s27_s28), 0  ;;  %s4561_s29 = smov (!%p28_p0, %s30_s29), %s2641_s24 }
   0xa   : > { %4406 = sst [smem:[#allocation10_spill]] %s4559_s28  ;;  %s119_s30 = ssub.s32 %s2637_s23, %s4559_s28 }
   0xb   : > { %p2730_p3 = por %p134_p2, %p133_p1  ;;  %p32_p4 = scmp.ge.s32.totalorder %s4561_s29, 2 }
   0xc   : > { %p140_p6 = scmp.eq.s32.totalorder %s2173_s27, 3  ;;  %p2175_p7 = scmp.ge.s32.totalorder %s2645_s25, 1 }
   0xd   : > { %s4563_s29 = smov (%p32_p4, %s4561_s29), 0  ;;  %p170_p9 = scmp.lt.s32.totalorder %s2645_s25, 5 }
   0xe   : > { %4408 = sst [smem:[#allocation11_spill]] %s4563_s29  ;;  %p2739_p8 = por %p140_p6, %p139_p5 }
   0xf   : > { %s118_s8 = ssub.s32 %s2641_s24, %s4563_s29  ;;  %s123_s9 = sadd.s32 1, %s2625_s20 }
  0x10   : > { %s120_s10 = sor.u32 %s119_s30, %s118_s8  ;;  %p171_p10 = pnand %p2175_p7, %p170_p9 }
  0x11   : > { %p121_p11 = scmp.eq.s32.totalorder %s120_s10, 0 }
  0x12   : > { %174 = sbr.rel (%p171_p10) target bundleno = 542 (0x21e), region = 36 }
  0x13   : > { %s2748_s11 = scalar_select %p121_p11, %s2625_s20, %s123_s9  }
  0x17   : > { %s4328_s12 = sand.u32 1, %s2621_s19   ;;  %p192_p12 = scmp.lt.s32.totalorder %s2629_s21, 0 }
  0x18   : > { %s2176_s13 = sshll.u32 %s4328_s12, 7  ;;  %s193_s14 = ssub.s32 0, %s2629_s21 }
  0x19   : > { %s2177_s15 = smin.u32 %s2629_s21, %s193_s14  ;;  %s2758_s27 = scalar_lea.vmem [#allocation4], %s2176_s13 }
  0x1a   : > { %s195_s16 = sand.u32 1, %s2177_s15   ;;  %p2180_p0 = scmp.ne.s32.totalorder %s2629_s21, 0 }
  0x1b   : > { %s196_s17 = ssub.s32 0, %s195_s16  ;;  %s2182_s30 = smul.u32 (!%p2180_p0), 192, %s2629_s21 }
  0x1c   : > { %s4565_s17 = smov (!%p192_p12, %s196_s17), %s195_s16  ;;  %207 = sbr.rel (%p2180_p0) target bundleno = 66 (0x42), region = 40 }
  0x1d   : > { %p2179_p13 = scmp.lt.s32.totalorder %s4565_s17, 0  ;;  %s202_s26 = sadd.s32 2, %s4565_s17 }
  0x1e   : > { %s210_s8 = smul.u32 (!%p2180_p0), 432, %s2633_s22 }
  0x1f   : > { %s4567_s26 = smov (!%p2179_p13, %s202_s26), %s4565_s17 }
  0x20   : > { %s213_s9 = smul.u32 (!%p2180_p0), 240, %s4567_s26  ;;  %s211_s10 = sadd.s32 (!%p2180_p0), %s2182_s30, %s210_s8 }
  0x21   : > { %s2767_s16 = scalar_lea.vmem %s4322_s0, %s211_s10  ;;  %s215_s17 = scalar_lea.sflag [#allocation3], %s4567_s26 }
  0x22   : > { %v228_v0 = vld [vmem:[%s2767_s16] sm:$0xff]  ;;  %v230_v1 = vld [vmem:[%s2767_s16 + $0x8] sm:$0xff]  ;;  %v232_v2 = vld [vmem:[%s2767_s16 + $0x18] sm:$0xff]  ;;  %s2772_s13 = scalar_lea.vmem [#allocation2], %s213_s9 }
  0x23   : > { %229 = vst [vmem:[%s2772_s13] sm:$0xff] %v228_v0  ;;  %v234_v3 = vld [vmem:[%s2767_s16 + $0x20] sm:$0xff]  ;;  %v236_v4 = vld [vmem:[%s2767_s16 + $0x30] sm:$0xff]  ;;  %v238_v5 = vld [vmem:[%s2767_s16 + $0x38] sm:$0xff] }
  0x24   : > { %231 = vst [vmem:[%s2772_s13 + $0x8] sm:$0xff] %v230_v1  ;;  %v240_v6 = vld [vmem:[%s2767_s16 + $0x48] sm:$0xff]  ;;  %v242_v7 = vld [vmem:[%s2767_s16 + $0x50] sm:$0xff]  ;;  %v244_v8 = vld [vmem:[%s2767_s16 + $0x60] sm:$0xff] }
  0x25   : > { %233 = vst [vmem:[%s2772_s13 + $0x18] sm:$0xff] %v232_v2  ;;  %v246_v9 = vld [vmem:[%s2767_s16 + $0x68] sm:$0xff]  ;;  %v248_v10 = vld [vmem:[%s2767_s16 + $0x78] sm:$0xff]  ;;  %v250_v11 = vld [vmem:[%s2767_s16 + $0x80] sm:$0xff] }
  0x26   : > { %235 = vst [vmem:[%s2772_s13 + $0x20] sm:$0xff] %v234_v3  ;;  %v252_v12 = vld [vmem:[%s2767_s16 + $0x90] sm:$0xff]  ;;  %v254_v13 = vld [vmem:[%s2767_s16 + $0x98] sm:$0xff]  ;;  %v256_v14 = vld [vmem:[%s2767_s16 + $0xa8] sm:$0xff] }
  0x27   : > { %237 = vst [vmem:[%s2772_s13 + $0x30] sm:$0xff] %v236_v4  ;;  %v258_v15 = vld [vmem:[%s2767_s16 + $0xb0] sm:$0xff]  ;;  %v260_v16 = vld [vmem:[%s2767_s16 + $0xc0] sm:$0xff]  ;;  %v262_v17 = vld [vmem:[%s2767_s16 + $0xc8] sm:$0xff] }
  0x28   : > { %239 = vst [vmem:[%s2772_s13 + $0x38] sm:$0xff] %v238_v5  ;;  %v264_v18 = vld [vmem:[%s2767_s16 + $0xd8] sm:$0xff]  ;;  %v266_v19 = vld [vmem:[%s2767_s16 + $0xe0] sm:$0xff]  ;;  %v2183_v20 = vld [vmem:[%s2767_s16 + $0x10] sm:$0x3] }
  0x29   : > { %241 = vst [vmem:[%s2772_s13 + $0x48] sm:$0xff] %v240_v6  ;;  %v2185_v21 = vld [vmem:[%s2767_s16 + $0x28] sm:$0x3]  ;;  %v2187_v22 = vld [vmem:[%s2767_s16 + $0x40] sm:$0x3] }
  0x2a   : > { %243 = vst [vmem:[%s2772_s13 + $0x50] sm:$0xff] %v242_v7  ;;  %v2189_v23 = vld [vmem:[%s2767_s16 + $0x58] sm:$0x3]  ;;  %v2191_v24 = vld [vmem:[%s2767_s16 + $0x70] sm:$0x3] }
  0x2b   : > { %245 = vst [vmem:[%s2772_s13 + $0x60] sm:$0xff] %v244_v8  ;;  %v2193_v25 = vld [vmem:[%s2767_s16 + $0x88] sm:$0x3]  ;;  %v2195_v26 = vld [vmem:[%s2767_s16 + $0xa0] sm:$0x3] }
  0x2c   : > { %247 = vst [vmem:[%s2772_s13 + $0x68] sm:$0xff] %v246_v9  ;;  %v2197_v27 = vld [vmem:[%s2767_s16 + $0xb8] sm:$0x3]  ;;  %v2199_v28 = vld [vmem:[%s2767_s16 + $0xd0] sm:$0x3] }
  0x2d   : > { %249 = vst [vmem:[%s2772_s13 + $0x78] sm:$0xff] %v248_v10  ;;  %v2201_v29 = vld [vmem:[%s2767_s16 + $0xe8] sm:$0x3] }
  0x2e   : > { %251 = vst [vmem:[%s2772_s13 + $0x80] sm:$0xff] %v250_v11 }
  0x2f   : > { %253 = vst [vmem:[%s2772_s13 + $0x90] sm:$0xff] %v252_v12 }
  0x30   : > { %255 = vst [vmem:[%s2772_s13 + $0x98] sm:$0xff] %v254_v13 }
  0x31   : > { %257 = vst [vmem:[%s2772_s13 + $0xa8] sm:$0xff] %v256_v14 }
  0x32   : > { %259 = vst [vmem:[%s2772_s13 + $0xb0] sm:$0xff] %v258_v15 }
  0x33   : > { %261 = vst [vmem:[%s2772_s13 + $0xc0] sm:$0xff] %v260_v16 }
  0x34   : > { %263 = vst [vmem:[%s2772_s13 + $0xc8] sm:$0xff] %v262_v17 }
  0x35   : > { %265 = vst [vmem:[%s2772_s13 + $0xd8] sm:$0xff] %v264_v18 }
  0x36   : > { %267 = vst [vmem:[%s2772_s13 + $0xe0] sm:$0xff] %v266_v19 }
  0x37   : > { %2184 = vst [vmem:[%s2772_s13 + $0x10] sm:$0x3] %v2183_v20 }
  0x38   : > { %2186 = vst [vmem:[%s2772_s13 + $0x28] sm:$0x3] %v2185_v21 }
  0x39   : > { %2188 = vst [vmem:[%s2772_s13 + $0x40] sm:$0x3] %v2187_v22 }
  0x3a   : > { %2190 = vst [vmem:[%s2772_s13 + $0x58] sm:$0x3] %v2189_v23 }
  0x3b   : > { %2192 = vst [vmem:[%s2772_s13 + $0x70] sm:$0x3] %v2191_v24 }
  0x3c   : > { %2194 = vst [vmem:[%s2772_s13 + $0x88] sm:$0x3] %v2193_v25 }
  0x3d   : > { %2196 = vst [vmem:[%s2772_s13 + $0xa0] sm:$0x3] %v2195_v26 }
  0x3e   : > { %2198 = vst [vmem:[%s2772_s13 + $0xb8] sm:$0x3] %v2197_v27 }
  0x3f   : > { %2200 = vst [vmem:[%s2772_s13 + $0xd0] sm:$0x3] %v2199_v28 }
  0x40   : > { %2202 = vst [vmem:[%s2772_s13 + $0xe8] sm:$0x3] %v2201_v29 }
  0x41   : > { %301 = vsyncadd %s215_s17, 2880 }
  0x42 PF: > { %s302_s30 = smul.u32 240, %s4567_s26  ;;  %s304_s9 = scalar_lea.sflag [#allocation3], %s4567_s26 }
  0x44   : > { %s2833_s8 = scalar_lea.vmem [#allocation2], %s302_s30 }
  0x45   : > { %2609 = dma.done.wait %s304_s9, 2880 }
  0x46   : > { %2610 = vsyncadd %s304_s9, 4294964416  ;;  %s309_s10 = sadd.s32 1, %s2629_s21 }
  0x47   : > { %p2203_p1 = scmp.ge.s32.totalorder %s309_s10, 2 }
  0x48   : > { %p314_p2 = scmp.lt.s32.totalorder (!%p2203_p1), %s309_s10, 0  ;;  %s315_s14 = ssub.s32 (!%p2203_p1), 0, %s309_s10 }
  0x49   : > { %313 = sbr.rel (%p2203_p1) target bundleno = 116 (0x74), region = 66  ;;  %s2204_s15 = smin.u32 (!%p2203_p1), %s315_s14, %s309_s10 }
  0x4a   : > { %s2110_s16 = smul.u32 (!%p2203_p1), 192, %s2629_s21  ;;  %s317_s13 = sand.u32 (!%p2203_p1), 1, %s2204_s15  }
  0x4b   : > { %s2111_s17 = smul.u32 (!%p2203_p1), 432, %s2633_s22  ;;  %s318_s12 = ssub.s32 (!%p2203_p1), 0, %s317_s13 }
  0x4d   : > { %s2112_s29 = sadd.s32 (!%p2203_p1), %s2111_s17, %s2110_s16 }
  0x4e   : > { %s4569_s12 = smov (!%p314_p2, %s318_s12), %s317_s13  ;;  %s2842_s9 = scalar_lea.vmem %s4322_s0, %s2112_s29 }
  0x4f   : > { %p2206_p4 = scmp.lt.s32.totalorder %s4569_s12, 0  ;;  %s324_s30 = sadd.s32 2, %s4569_s12  ;;  %v2207_v30 = vld [vmem:[%s2842_s9 + $0xc0] sm:$0xff]  ;;  %v2208_v31 = vld [vmem:[%s2842_s9 + $0xc8] sm:$0xff]  ;;  %v2209_v32 = vld [vmem:[%s2842_s9 + $0xd8] sm:$0xff] }
  0x50   : > { %v2210_v33 = vld [vmem:[%s2842_s9 + $0xe0] sm:$0xff]  ;;  %v2211_v34 = vld [vmem:[%s2842_s9 + $0xf0] sm:$0xff]  ;;  %v2212_v35 = vld [vmem:[%s2842_s9 + $0xf8] sm:$0xff] }
  0x51   : > { %s4571_s30 = smov (!%p2206_p4, %s324_s30), %s4569_s12  ;;  %v2213_v36 = vld [vmem:[%s2842_s9 + $0x108] sm:$0xff]  ;;  %v2214_v37 = vld [vmem:[%s2842_s9 + $0x110] sm:$0xff]  ;;  %v2215_v38 = vld [vmem:[%s2842_s9 + $0x120] sm:$0xff] }
  0x52   : > { %s331_s10 = smul.u32 240, %s4571_s30  ;;  %v2216_v39 = vld [vmem:[%s2842_s9 + $0x128] sm:$0xff]  ;;  %v2217_v40 = vld [vmem:[%s2842_s9 + $0x138] sm:$0xff]  ;;  %v2218_v41 = vld [vmem:[%s2842_s9 + $0x140] sm:$0xff]  ;;  %s333_s29 = scalar_lea.sflag [#allocation3], %s4571_s30 }
  0x53   : > { %v2219_v42 = vld [vmem:[%s2842_s9 + $0x150] sm:$0xff]  ;;  %v2220_v43 = vld [vmem:[%s2842_s9 + $0x158] sm:$0xff]  ;;  %v2221_v44 = vld [vmem:[%s2842_s9 + $0x168] sm:$0xff] }
  0x54   : > { %s2850_s28 = scalar_lea.vmem [#allocation2], %s331_s10  ;;  %v2222_v45 = vld [vmem:[%s2842_s9 + $0x170] sm:$0xff]  ;;  %v2223_v46 = vld [vmem:[%s2842_s9 + $0x180] sm:$0xff]  ;;  %v2224_v47 = vld [vmem:[%s2842_s9 + $0x188] sm:$0xff] }
  0x55   : > { %347 = vst [vmem:[%s2850_s28] sm:$0xff] %v2207_v30  ;;  %v2225_v48 = vld [vmem:[%s2842_s9 + $0x198] sm:$0xff]  ;;  %v2226_v49 = vld [vmem:[%s2842_s9 + $0x1a0] sm:$0xff]  ;;  %v2227_v50 = vld [vmem:[%s2842_s9 + $0xd0] sm:$0x3] }
  0x56   : > { %349 = vst [vmem:[%s2850_s28 + $0x8] sm:$0xff] %v2208_v31  ;;  %v2229_v51 = vld [vmem:[%s2842_s9 + $0xe8] sm:$0x3]  ;;  %v2231_v52 = vld [vmem:[%s2842_s9 + $0x100] sm:$0x3] }
  0x57   : > { %351 = vst [vmem:[%s2850_s28 + $0x18] sm:$0xff] %v2209_v32  ;;  %v2233_v53 = vld [vmem:[%s2842_s9 + $0x118] sm:$0x3]  ;;  %v2235_v54 = vld [vmem:[%s2842_s9 + $0x130] sm:$0x3] }
  0x58   : > { %353 = vst [vmem:[%s2850_s28 + $0x20] sm:$0xff] %v2210_v33  ;;  %v2237_v55 = vld [vmem:[%s2842_s9 + $0x148] sm:$0x3]  ;;  %v2239_v56 = vld [vmem:[%s2842_s9 + $0x160] sm:$0x3] }
  0x59   : > { %355 = vst [vmem:[%s2850_s28 + $0x30] sm:$0xff] %v2211_v34  ;;  %v2241_v57 = vld [vmem:[%s2842_s9 + $0x178] sm:$0x3]  ;;  %v2243_v58 = vld [vmem:[%s2842_s9 + $0x190] sm:$0x3] }
  0x5a   : > { %357 = vst [vmem:[%s2850_s28 + $0x38] sm:$0xff] %v2212_v35  ;;  %v2245_v59 = vld [vmem:[%s2842_s9 + $0x1a8] sm:$0x3] }
  0x5b   : > { %359 = vst [vmem:[%s2850_s28 + $0x48] sm:$0xff] %v2213_v36 }
  0x5c   : > { %361 = vst [vmem:[%s2850_s28 + $0x50] sm:$0xff] %v2214_v37 }
  0x5d   : > { %363 = vst [vmem:[%s2850_s28 + $0x60] sm:$0xff] %v2215_v38 }
  0x5e   : > { %365 = vst [vmem:[%s2850_s28 + $0x68] sm:$0xff] %v2216_v39 }
  0x5f   : > { %367 = vst [vmem:[%s2850_s28 + $0x78] sm:$0xff] %v2217_v40 }
  0x60   : > { %369 = vst [vmem:[%s2850_s28 + $0x80] sm:$0xff] %v2218_v41 }
  0x61   : > { %371 = vst [vmem:[%s2850_s28 + $0x90] sm:$0xff] %v2219_v42 }
  0x62   : > { %373 = vst [vmem:[%s2850_s28 + $0x98] sm:$0xff] %v2220_v43 }
  0x63   : > { %375 = vst [vmem:[%s2850_s28 + $0xa8] sm:$0xff] %v2221_v44 }
  0x64   : > { %377 = vst [vmem:[%s2850_s28 + $0xb0] sm:$0xff] %v2222_v45 }
  0x65   : > { %379 = vst [vmem:[%s2850_s28 + $0xc0] sm:$0xff] %v2223_v46 }
  0x66   : > { %381 = vst [vmem:[%s2850_s28 + $0xc8] sm:$0xff] %v2224_v47 }
  0x67   : > { %383 = vst [vmem:[%s2850_s28 + $0xd8] sm:$0xff] %v2225_v48 }
  0x68   : > { %385 = vst [vmem:[%s2850_s28 + $0xe0] sm:$0xff] %v2226_v49 }
  0x69   : > { %2228 = vst [vmem:[%s2850_s28 + $0x10] sm:$0x3] %v2227_v50 }
  0x6a   : > { %2230 = vst [vmem:[%s2850_s28 + $0x28] sm:$0x3] %v2229_v51 }
  0x6b   : > { %2232 = vst [vmem:[%s2850_s28 + $0x40] sm:$0x3] %v2231_v52 }
  0x6c   : > { %2234 = vst [vmem:[%s2850_s28 + $0x58] sm:$0x3] %v2233_v53 }
  0x6d   : > { %2236 = vst [vmem:[%s2850_s28 + $0x70] sm:$0x3] %v2235_v54 }
  0x6e   : > { %2238 = vst [vmem:[%s2850_s28 + $0x88] sm:$0x3] %v2237_v55 }
  0x6f   : > { %2240 = vst [vmem:[%s2850_s28 + $0xa0] sm:$0x3] %v2239_v56 }
  0x70   : > { %2242 = vst [vmem:[%s2850_s28 + $0xb8] sm:$0x3] %v2241_v57 }
  0x71   : > { %2244 = vst [vmem:[%s2850_s28 + $0xd0] sm:$0x3] %v2243_v58 }
  0x72   : > { %2246 = vst [vmem:[%s2850_s28 + $0xe8] sm:$0x3] %v2245_v59 }
  0x73   : > { %419 = vsyncadd %s333_s29, 2880 }
  0x74 PF: > { %v1635_v60 = vld [vmem:[%s4325_s3 + $0x78] sm:$0xff]  ;;  %v1634_v61 = vld [vmem:[%s4325_s3 + $0x70] sm:$0xff]  ;;  %v1633_v62 = vld [vmem:[%s4325_s3 + $0x68] sm:$0xff]  ;;  %vm535_vm0 = vcmask 1046528   ;;  %vm657_vm1 = vcmask 1045504   ;;  %s2288_s26 = sshll.u32 %s2629_s21, 4 }
  0x75   : > { %1640 = vmatpush.msra.mxu0 %v1635_v60  ;;  %2289 = vmatpush.msra.mxu1 %v1635_v60  ;;  %v1632_v63 = vld [vmem:[%s4325_s3 + $0x60] sm:$0xff]  ;;  %v1631_v0 = vld [vmem:[%s4325_s3 + $0x58] sm:$0xff]  ;;  %v1630_v1 = vld [vmem:[%s4325_s3 + $0x50] sm:$0xff]  ;;  %s2282_s9 = sshll.u32 %s2633_s22, 5  ;;  %s2057_s21 = sshll.u32 %s2758_s27, 4  ;;  %s2058_s21 = int_to_ptr.vmem [resolvable:$true] %s2057_s21 }
  0x76   : > { %2290 = vmatpush.msra.mxu2 %v1635_v60  ;;  %2291 = vmatpush.msra.mxu3 %v1635_v60  ;;  %v450_v5 = vld [vmem:[%s4323_s1] sm:$0x7]  ;;  %v451_v6 = vld [vmem:[%s4323_s1 + $0x4] sm:$0x7]  ;;  %v452_v7 = vld [vmem:[%s4323_s1 + $0x8] sm:$0x7]  ;;  %s2054_s10 = sadd.s32 %s2288_s26, %s2282_s9 }
  0x77   : > { %1641 = vmatpush.msra.mxu0 %v1634_v61  ;;  %2292 = vmatpush.msra.mxu1 %v1634_v61  ;;  %v2944_v8 = vperm.slane %v450_v5, 0  ;;  %v2946_v9 = vperm.slane %v450_v5, 1  ;;  %v2948_v10 = vperm.slane %v450_v5, 2  ;;  %v2950_v11 = vperm.slane %v451_v6, 0  ;;  %v1629_v16 = vld [vmem:[%s4325_s3 + $0x48] sm:$0xff]  ;;  %v1628_v25 = vld [vmem:[%s4325_s3 + $0x40] sm:$0xff] }
  0x78   : > { %2293 = vmatpush.msra.mxu2 %v1634_v61  ;;  %2294 = vmatpush.msra.mxu3 %v1634_v61  ;;  %v2955_v13 = vperm.slane %v451_v6, 1  ;;  %v2957_v14 = vperm.slane %v451_v6, 2  ;;  %v2959_v15 = vperm.slane %v452_v7, 0  ;;  %v2970_v20 = vperm.slane %v452_v7, 1  ;;  %v1627_v35 = vld [vmem:[%s4325_s3 + $0x38] sm:$0xff]  ;;  %v1626_v45 = vld [vmem:[%s4325_s3 + $0x30] sm:$0xff] }
  0x79   : > { %1642 = vmatpush.msra.mxu0 %v1633_v62  ;;  %2295 = vmatpush.msra.mxu1 %v1633_v62  ;;  %v420_v2 = vld [vmem:[%s2833_s8] sm:$0xff]  ;;  %v2930_v3 = vld [vmem:[%s2833_s8 + $0x8] sm:$0xff]  ;;  %v2933_v4 = vld [vmem:[%s2833_s8 + $0x18] sm:$0xff]  ;;  %v2979_v24 = vperm.slane %v452_v7, 2  ;;  %s2283_s28 = sshll.u32 %s2054_s10, 3  ;;  %s4548_s15 = sand.u32 1, %s2621_s19  }
  0x7a   : > { %2296 = vmatpush.msra.mxu2 %v1633_v62  ;;  %2297 = vmatpush.msra.mxu3 %v1633_v62  ;;  %4410 = vst [vmem:[#allocation12_spill] sm:$0xff] %v2933_v4  ;;  %v2953_v12 = vld [vmem:[%s2833_s8 + $0x20] sm:$0xff]  ;;  %v454_v17 = vmul.f32 %v2944_v8, %v420_v2  ;;  %v487_v18 = vmul.f32 %v2946_v9, %v420_v2  ;;  %v2992_v30 = vld [vmem:[%s2833_s8 + $0x30] sm:$0xff]  ;;  %v3013_v40 = vld [vmem:[%s2833_s8 + $0x38] sm:$0xff]  ;;  %s2056_s14 = scalar_lea.hbm %s4327_s5, %s2283_s28  ;;  %s2042_s16 = scalar_lea.sflag [#allocation5], %s4548_s15 }
  0x7b   : > { %1643 = vmatpush.msra.mxu0 %v1632_v63  ;;  %2298 = vmatpush.msra.mxu1 %v1632_v63  ;;  %v2968_v19 = vmul.f32 %v2946_v9, %v2930_v3  ;;  %v609_v21 = vmul.f32 %v2948_v10, %v420_v2  ;;  %v2975_v22 = vmul.f32 %v2948_v10, %v2930_v3  ;;  %v1625_v52 = vld [vmem:[%s4325_s3 + $0x28] sm:$0xff]  ;;  %v1624_v62 = vld [vmem:[%s4325_s3 + $0x20] sm:$0xff]  ;;  %s2059_s22 = sshll.u32 %s2056_s14, 4  ;;  %s2569_s26 = scalar_lea.hbm %s4327_s5, 512  ;;  %s2060_s22 = int_to_ptr.hbm [resolvable:$true] %s2059_s22 }
  0x7c   : > { %2299 = vmatpush.msra.mxu2 %v1632_v63  ;;  %2300 = vmatpush.msra.mxu3 %v1632_v63  ;;  %v731_v23 = vmul.f32 %v2950_v11, %v2933_v4  ;;  %v536_v26 = vrot.slane %v487_v18, 1  ;;  %v764_v28 = vmul.f32 %v2955_v13, %v2933_v4  ;;  %v2989_v29 = vmul.f32 %v2955_v13, %v2953_v12  ;;  %v3045_v56 = vld [vmem:[%s2833_s8 + $0x48] sm:$0xff]  ;;  %s2563_s13 = sshra.s32 %s2060_s22, 4  ;;  %s2564_s13 = int_to_ptr.hbm [resolvable:$true] %s2563_s13 }
  0x7d   : > { %1644 = vmatpush.msra.mxu0 %v1631_v0  ;;  %2301 = vmatpush.msra.mxu1 %v1631_v0  ;;  %v4347_v27 = vrot.slane %v2968_v19, 1  ;;  %4411 = vst [vmem:[#allocation13_spill] sm:$0xff] %v2992_v30  ;;  %v658_v31 = vrot.slane %v609_v21, 2  ;;  %v4345_v32 = vrot.slane %v2975_v22, 2  ;;  %v885_v33 = vmul.f32 %v2957_v14, %v2933_v4  ;;  %v1623_v18 = vld [vmem:[%s4325_s3 + $0x18] sm:$0xff]  ;;  %s2565_s17 = scalar_lea.hbm %s2564_s13, 128  ;;  %p2570_p9 = scmp.lt.s32.totalorder %s2564_s13, %s4327_s5 }
  0x7e   : > { %2302 = vmatpush.msra.mxu2 %v1631_v0  ;;  %2303 = vmatpush.msra.mxu3 %v1631_v0  ;;  %v2999_v34 = vmul.f32 %v2957_v14, %v2953_v12  ;;  %v812_v37 = vrot.slane %v764_v28, 1  ;;  %v4344_v38 = vrot.slane %v2989_v29, 1  ;;  %v3010_v39 = vmul.f32 %v2959_v15, %v2992_v30  ;;  %4412 = vst [vmem:[#allocation14_spill] sm:$0xff] %v3045_v56  ;;  %p2566_p5 = scmp.ne.s32.totalorder %s2564_s13, %s2565_s17  ;;  %p2571_p10 = scmp.lt.s32.totalorder %s2569_s26, %s2565_s17 }
  0x7f   : > { %1645 = vmatpush.msra.mxu0 %v1630_v1  ;;  %2304 = vmatpush.msra.mxu1 %v1630_v1  ;;  %v538_v36 = vsel %vm535_vm0, %v536_v26, %v4347_v27  ;;  %v660_v42 = vsel %vm657_vm1, %v658_v31, %v4345_v32  ;;  %v933_v43 = vrot.slane %v885_v33, 2  ;;  %v1039_v47 = vmul.f32 %v2970_v20, %v2992_v30 }
  0x80   : > { %2305 = vmatpush.msra.mxu2 %v1630_v1  ;;  %2306 = vmatpush.msra.mxu3 %v1630_v1  ;;  %v592_v41 = vadd.f32 %v538_v36, %v454_v17  ;;  %v4342_v44 = vrot.slane %v2999_v34, 2  ;;  %v814_v46 = vsel %vm535_vm0, %v812_v37, %v4344_v38  ;;  %v3029_v48 = vmul.f32 %v2970_v20, %v3013_v40  ;;  %v3063_v1 = vld [vmem:[%s2833_s8 + $0x50] sm:$0xff]  ;;  %v3094_v36 = vld [vmem:[%s2833_s8 + $0x60] sm:$0xff]  ;;  %p2567_p6 = pnand %p2566_p5, %p2730_p3  ;;  %p2572_p11 = por %p2571_p10, %p2570_p9 }
  0x81   : > { %1646 = vmatpush.msra.mxu0 %v1629_v16  ;;  %2307 = vmatpush.msra.mxu1 %v1629_v16  ;;  %v1160_v51 = vmul.f32 %v2979_v24, %v2992_v30  ;;  %v1087_v53 = vrot.slane %v1039_v47, 1  ;;  %v3042_v55 = vmul.f32 %v2979_v24, %v3013_v40  ;;  %v458_v57 = vmul.f32 %v2944_v8, %v2992_v30 }
  0x82   : > { %2308 = vmatpush.msra.mxu2 %v1629_v16  ;;  %2309 = vmatpush.msra.mxu3 %v1629_v16  ;;  %v714_v49 = vadd.f32 %v660_v42, %v592_v41  ;;  %v935_v50 = vsel %vm657_vm1, %v933_v43, %v4342_v44  ;;  %v4341_v54 = vrot.slane %v3029_v48, 1  ;;  %v493_v60 = vmul.f32 %v2946_v9, %v2992_v30  ;;  %p2568_p7 = pneg %p2567_p6 }
  0x83   : > { %1647 = vmatpush.msra.mxu0 %v1628_v25  ;;  %2310 = vmatpush.msra.mxu1 %v1628_v25  ;;  %v1208_v59 = vrot.slane %v1160_v51, 2  ;;  %v3053_v61 = vmul.f32 %v2946_v9, %v3013_v40  ;;  %v4338_v0 = vrot.slane %v3042_v55, 2  ;;  %v615_v2 = vmul.f32 %v2948_v10, %v2992_v30  ;;  %4413 = vst [vmem:[#allocation15_spill] sm:$0xff] %v3094_v36  ;;  %v1621_v51 = vld [vmem:[%s4325_s3 + $0x8] sm:$0xff] }
  0x84   : > { %2311 = vmatpush.msra.mxu2 %v1628_v25  ;;  %2312 = vmatpush.msra.mxu3 %v1628_v25  ;;  %v747_v58 = vadd.f32 %v731_v23, %v714_v49  ;;  %v1089_v63 = vsel %vm535_vm0, %v1087_v53, %v4341_v54  ;;  %v3069_v5 = vmul.f32 %v2948_v10, %v3013_v40  ;;  %v546_v7 = vrot.slane %v493_v60, 1  ;;  %p2573_p12 = pnand %p2572_p11, %p2568_p7 }
  0x85   : > { %1648 = vmatpush.msra.mxu0 %v1627_v35  ;;  %2313 = vmatpush.msra.mxu1 %v1627_v35  ;;  %v4337_v16 = vrot.slane %v3053_v61, 1  ;;  %v735_v17 = vmul.f32 %v2950_v11, %v3045_v56  ;;  %v1210_v21 = vsel %vm657_vm1, %v1208_v59, %v4338_v0  ;;  %v668_v23 = vrot.slane %v615_v2, 2  ;;  %v3124_v59 = vld [vmem:[%s4324_s2] ss:$0 sm:$0xff] }
  0x86   : > { %2314 = vmatpush.msra.mxu2 %v1627_v35  ;;  %2315 = vmatpush.msra.mxu3 %v1627_v35  ;;  %v868_v6 = vadd.f32 %v814_v46, %v747_v58  ;;  %v4336_v25 = vrot.slane %v3069_v5, 2  ;;  %v770_v26 = vmul.f32 %v2955_v13, %v3045_v56  ;;  %v3088_v33 = vmul.f32 %v2955_v13, %v3063_v1  ;;  %v1622_v35 = vld [vmem:[%s4325_s3 + $0x10] sm:$0xff]  ;;  %v3103_v46 = vld [vmem:[%s2833_s8 + $0x68] sm:$0xff] }
  0x87   : > { %1649 = vmatpush.msra.mxu0 %v1626_v45  ;;  %2316 = vmatpush.msra.mxu1 %v1626_v45  ;;  %v548_v31 = vsel %vm535_vm0, %v546_v7, %v4337_v16  ;;  %v891_v43 = vmul.f32 %v2957_v14, %v3045_v56  ;;  %v3108_v49 = vmul.f32 %v2957_v14, %v3063_v1 }
  0x88   : > { %2317 = vmatpush.msra.mxu2 %v1626_v45  ;;  %2318 = vmatpush.msra.mxu3 %v1626_v45  ;;  %v989_v28 = vadd.f32 %v935_v50, %v868_v6  ;;  %v596_v37 = vadd.f32 %v548_v31, %v458_v57  ;;  %v670_v41 = vsel %vm657_vm1, %v668_v23, %v4336_v25  ;;  %v822_v42 = vrot.slane %v770_v26, 1 }
  0x89   : > { %1650 = vmatpush.msra.mxu0 %v1625_v52  ;;  %2319 = vmatpush.msra.mxu1 %v1625_v52  ;;  %v4334_v47 = vrot.slane %v3088_v33, 1  ;;  %v1010_v50 = vmul.f32 %v2959_v15, %v3094_v36  ;;  %v943_v53 = vrot.slane %v891_v43, 2  ;;  %v3119_v57 = vmul.f32 %v2970_v20, %v3103_v46 }
  0x8a   : > { %2320 = vmatpush.msra.mxu2 %v1625_v52  ;;  %2321 = vmatpush.msra.mxu3 %v1625_v52  ;;  %v1022_v45 = vadd.f32 %v3010_v39, %v989_v28  ;;  %v718_v52 = vadd.f32 %v670_v41, %v596_v37  ;;  %v1045_v39 = vmul.f32 %v2970_v20, %v3094_v36 }
  0x8b   : > { %1651 = vmatpush.msra.mxu0 %v1624_v62  ;;  %2322 = vmatpush.msra.mxu1 %v1624_v62  ;;  %v824_v60 = vsel %vm535_vm0, %v822_v42, %v4334_v47  ;;  %v1166_v2 = vmul.f32 %v2979_v24, %v3094_v36  ;;  %v3138_v23 = vmul.f32 %v2979_v24, %v3103_v46  ;;  %v3150_v42 = vld [vmem:[%s2833_s8 + $0x78] sm:$0xff]  ;;  %v3197_v47 = vld [vmem:[%s2833_s8 + $0x90] sm:$0xff] }
  0x8c   : > { %2323 = vmatpush.msra.mxu2 %v1624_v62  ;;  %2324 = vmatpush.msra.mxu3 %v1624_v62  ;;  %v1143_v58 = vadd.f32 %v1089_v63, %v1022_v45  ;;  %v4333_v62 = vrot.slane %v3108_v49, 2  ;;  %v1620_v63 = vld [vmem:[%s4325_s3] sm:$0xff]  ;;  %v751_v6 = vadd.f32 %v735_v17, %v718_v52  ;;  %v1097_v7 = vrot.slane %v1045_v39, 1  ;;  %4414 = vst [vmem:[#allocation16_spill] sm:$0xff] %v3150_v42 }
  0x8d   : > { %1652 = vmatpush.msra.mxu0 %v1623_v18  ;;  %2325 = vmatpush.msra.mxu1 %v1623_v18  ;;  %v1218_v31 = vrot.slane %v1166_v2, 2  ;;  %v4331_v41 = vrot.slane %v3138_v23, 2  ;;  %v3158_v45 = vld [vmem:[%s2833_s8 + $0x80] sm:$0xff]  ;;  %v621_v52 = vmul.f32 %v2948_v10, %v3094_v36  ;;  %4415 = vst [vmem:[#allocation17_spill] sm:$0xff] %v3197_v47 }
  0x8e   : > { %2326 = vmatpush.msra.mxu2 %v1623_v18  ;;  %2327 = vmatpush.msra.mxu3 %v1623_v18  ;;  %v4332_v18 = vrot.slane %v3119_v57, 1  ;;  %v1264_v26 = vadd.f32 %v1210_v21, %v1143_v58  ;;  %v945_v28 = vsel %vm657_vm1, %v943_v53, %v4333_v62  ;;  %v872_v17 = vadd.f32 %v824_v60, %v751_v6 }
  0x8f   : > { %1653 = vmatpush.msra.mxu0 %v1622_v35  ;;  %2328 = vmatpush.msra.mxu1 %v1622_v35  ;;  %v499_v21 = vmul.f32 %v2946_v9, %v3094_v36  ;;  %v1220_v39 = vsel %vm657_vm1, %v1218_v31, %v4331_v41  ;;  %v3171_v60 = vmul.f32 %v2948_v10, %v3103_v46 }
  0x90   : > { %2329 = vmatpush.msra.mxu2 %v1622_v35  ;;  %2330 = vmatpush.msra.mxu3 %v1622_v35  ;;  %v462_v35 = vmul.f32 %v2944_v8, %v3094_v36  ;;  %v1099_v37 = vsel %vm535_vm0, %v1097_v7, %v4332_v18  ;;  %v3155_v43 = vadd.f32 %v3124_v59, %v1264_v26  ;;  %v678_v7 = vrot.slane %v621_v52, 2 }
  0x91   : > { %1654 = vmatpush.msra.mxu0 %v1621_v51  ;;  %2331 = vmatpush.msra.mxu1 %v1621_v51  ;;  %v993_v53 = vadd.f32 %v945_v28, %v872_v17  ;;  %v556_v58 = vrot.slane %v499_v21, 1  ;;  %v4339_v28 = vrot.slane %v3171_v60, 2  ;;  %v776_v31 = vmul.f32 %v2955_v13, %v3150_v42 }
  0x92   : > { %2332 = vmatpush.msra.mxu2 %v1621_v51  ;;  %2333 = vmatpush.msra.mxu3 %v1621_v51  ;;  %v3162_v51 = vmul.f32 %v2946_v9, %v3103_v46  ;;  %v2247_v2 = vmul.f32 -1.442695, %v3155_v43  ;;  %v3182_v17 = vmul.f32 %v2955_v13, %v3158_v45  ;;  %v897_v52 = vmul.f32 %v2957_v14, %v3150_v42 }
  0x93   : > { %1655 = vmatpush.msra.mxu0 %v1620_v63  ;;  %2334 = vmatpush.msra.mxu1 %v1620_v63  ;;  %v1026_v26 = vadd.f32 %v1010_v50, %v993_v53  ;;  %v3191_v50 = vmul.f32 %v2957_v14, %v3158_v45  ;;  %v680_v18 = vsel %vm657_vm1, %v678_v7, %v4339_v28  ;;  %v832_v62 = vrot.slane %v776_v31, 1 }
  0x94   : > { %2335 = vmatpush.msra.mxu2 %v1620_v63  ;;  %2336 = vmatpush.msra.mxu3 %v1620_v63  ;;  %v4335_v6 = vrot.slane %v3162_v51, 1  ;;  %v739_v63 = vmul.f32 %v2950_v11, %v3150_v42  ;;  %2412 = vpow2.f32 %v2247_v2  ;;  %v3200_v2 = vld [vmem:[%s2833_s8 + $0x98] sm:$0xff] }
  0x95   : > { %v1147_v53 = vadd.f32 %v1099_v37, %v1026_v26  ;;  %v4343_v25 = vrot.slane %v3191_v50, 2  ;;  %v1051_v37 = vmul.f32 %v2970_v20, %v3197_v47  ;;  %v1172_v26 = vmul.f32 %v2979_v24, %v3197_v47 }
  0x96   : > { %v558_v21 = vsel %vm535_vm0, %v556_v58, %v4335_v6  ;;  %v4340_v58 = vrot.slane %v3182_v17, 1  ;;  %v953_v6 = vrot.slane %v897_v52, 2  ;;  %v3217_v31 = vmul.f32 %v2979_v24, %v3200_v2 }
  0x97   : > { %v600_v41 = vadd.f32 %v558_v21, %v462_v35  ;;  %v1268_v16 = vadd.f32 %v1220_v39, %v1147_v53  ;;  %v3208_v35 = vmul.f32 %v2970_v20, %v3200_v2  ;;  %v1107_v39 = vrot.slane %v1051_v37, 1 }
  0x98   : > { %v834_v7 = vsel %vm535_vm0, %v832_v62, %v4340_v58  ;;  %4416 = vst [vmem:[#allocation18_spill] sm:$0xff] %v3217_v31  ;;  %v1228_v53 = vrot.slane %v1172_v26, 2  ;;  %v4348_v28 = vrot.slane %v3217_v31, 2  ;;  %v505_v62 = vmul.f32 %v2946_v9, %v3197_v47 }
  0x99   : > { %v722_v0 = vadd.f32 %v680_v18, %v600_v41  ;;  %v3220_v18 = vadd.f32 %v3124_v59, %v1268_v16  ;;  %v4346_v21 = vrot.slane %v3208_v35, 1  ;;  %v1014_v16 = vmul.f32 %v2959_v15, %v3197_v47 }
  0x9a   : > { %v2413_v52 = vpop.eup %2412  ;;  %v3239_v37 = vmul.f32 %v2946_v9, %v3200_v2  ;;  %v566_v26 = vrot.slane %v505_v62, 1  ;;  %v3253_v62 = vld [vmem:[%s2833_s8 + $0xb0] sm:$0xff]  ;;  %v3258_v32 = vmul.f32 %v2948_v10, %v3200_v2  ;;  %v4429_v31 = vrot.slane %v2968_v19, 1 }
  0x9b   : > { %v755_v41 = vadd.f32 %v739_v63, %v722_v0  ;;  %v3226_v58 = vadd.f32 1.0, %v2413_v52  ;;  %v2251_v54 = vmul.f32 -1.442695, %v3220_v18  ;;  %v955_v0 = vsel %vm657_vm1, %v953_v6, %v4343_v25  ;;  %v3235_v63 = vld [vmem:[%s2833_s8 + $0xa8] sm:$0xff]  ;;  %4419 = vst [vmem:[#allocation21_spill] sm:$0xff] %v3253_v62 }
  0x9c   : > { %4417 = vst [vmem:[#allocation19_spill] sm:$0xff] %v3235_v63  ;;  %v627_v52 = vmul.f32 %v2948_v10, %v3197_v47  ;;  %v1230_v6 = vsel %vm657_vm1, %v1228_v53, %v4348_v28  ;;  %v4355_v38 = vrot.slane %v3239_v37, 1  ;;  %v743_v53 = vmul.f32 %v2950_v11, %v3235_v63 }
  0x9d   : > { %v876_v44 = vadd.f32 %v834_v7, %v755_v41  ;;  %4418 = vst [vmem:[#allocation20_spill] sm:$0xff] %v3239_v37  ;;  %2414 = vrcp.f32 %v3226_v58  ;;  %v1109_v7 = vsel %vm535_vm0, %v1107_v39, %v4346_v21  ;;  %v466_v41 = vmul.f32 %v2944_v8, %v3197_v47  ;;  %v3271_v47 = vld [vmem:[%s2833_s8 + $0xc0] sm:$0xff] }
  0x9e   : > { %2416 = vpow2.f32 %v2251_v54  ;;  %4420 = vst [vmem:[#allocation22_spill] sm:$0xff] %v3258_v32  ;;  %v1373_v39 = vand.u32 2147483647, %v3226_v58  ;;  %v1375_v21 = vand.u32 2147483648, %v3226_v58  ;;  %v688_v27 = vrot.slane %v627_v52, 2 }
  0x9f   : > { %v997_v25 = vadd.f32 %v955_v0, %v876_v44  ;;  %v568_v44 = vsel %vm535_vm0, %v566_v26, %v4355_v38  ;;  %v4370_v54 = vrot.slane %v3258_v32, 2  ;;  %v782_v0 = vmul.f32 %v2955_v13, %v3235_v63  ;;  %4421 = vst [vmem:[#allocation23_spill] sm:$0xff] %v3271_v47 }
  0xa0   : > { %v604_v42 = vadd.f32 %v568_v44, %v466_v41  ;;  %v3275_v52 = vmul.f32 %v2955_v13, %v3253_v62  ;;  %v903_v36 = vmul.f32 %v2957_v14, %v3235_v63  ;;  %vm1369_vm2 = vweird.f32 %v3226_v58  ;;  %v3288_v44 = vld [vmem:[%s2833_s8 + $0xc8] sm:$0xff] }
  0xa1   : > { %v1030_v28 = vadd.f32 %v1014_v16, %v997_v25  ;;  %v3281_v25 = vmul.f32 %v2957_v14, %v3253_v62  ;;  %v690_v26 = vsel %vm657_vm1, %v688_v27, %v4370_v54  ;;  %v842_v38 = vrot.slane %v782_v0, 1  ;;  %4424 = vst [vmem:[#allocation26_spill] sm:$0xff] %v3288_v44 }
  0xa2   : > { %4422 = vst [vmem:[#allocation24_spill] sm:$0xff] %v3275_v52  ;;  %v726_v56 = vadd.f32 %v690_v26, %v604_v42  ;;  %v4368_v30 = vrot.slane %v3275_v52, 1  ;;  %v963_v4 = vrot.slane %v903_v36, 2  ;;  %vm3293_vm3 = vcmp.eq.f32.partialorder %v1373_v39, 8.507059e+37 }
  0xa3   : > { %4423 = vst [vmem:[#allocation25_spill] sm:$0xff] %v3281_v25  ;;  %v1151_v16 = vadd.f32 %v1109_v7, %v1030_v28  ;;  %v2415_v41 = vpop.eup %2414  ;;  %v4369_v63 = vrot.slane %v3281_v25, 2  ;;  %v1057_v27 = vmul.f32 %v2970_v20, %v3271_v47  ;;  %v1376_v7 = vor.u32 1.1754944e-38, %v1375_v21 }
  0xa4   : > { %v2417_v37 = vpop.eup %2416  ;;  %v1365_v62 = vmul.f32 %v2415_v41, %v3226_v58  ;;  %v759_v42 = vadd.f32 %v743_v53, %v726_v56  ;;  %v844_v36 = vsel %vm535_vm0, %v842_v38, %v4368_v30  ;;  %vm1370_vm4 = vweird.f32 %v2415_v41 }
  0xa5   : > { %v1272_v28 = vadd.f32 %v1230_v6, %v1151_v16  ;;  %v3299_v0 = vadd.f32 1.0, %v2417_v37  ;;  %v3309_v6 = vmul.f32 %v2970_v20, %v3288_v44  ;;  %v965_v21 = vsel %vm657_vm1, %v963_v4, %v4369_v63  ;;  %vm3322_vm5 = vmor %vm1369_vm2, %vm1370_vm4  ;;  %v3336_v63 = vld [vmem:[%s2833_s8 + $0x28] sm:$0x3] }
  0xa6   : > { %v1366_v26 = vsub.f32 1.0, %v1365_v62  ;;  %v1018_v56 = vmul.f32 %v2959_v15, %v3271_v47  ;;  %v1117_v38 = vrot.slane %v1057_v27, 1  ;;  %v880_v53 = vadd.f32 %v844_v36, %v759_v42 }
  0xa7   : > { %v3305_v39 = vadd.f32 %v3124_v59, %v1272_v28  ;;  %2418 = vrcp.f32 %v3299_v0  ;;  %v4378_v16 = vrot.slane %v3309_v6, 1  ;;  %v422_v28 = vld [vmem:[%s2833_s8 + $0x10] sm:$0x3]  ;;  %vm1429_vm6 = vweird.f32 %v3299_v0 }
  0xa8   : > { %v1367_v37 = vmul.f32 %v2415_v41, %v1366_v26  ;;  %v1433_v4 = vand.u32 2147483647, %v3299_v0  ;;  %v1178_v27 = vmul.f32 %v2979_v24, %v3271_v47  ;;  %v3332_v26 = vmul.f32 %v2979_v24, %v3288_v44 }
  0xa9   : > { %v2255_v62 = vmul.f32 -1.442695, %v3305_v39  ;;  %v1435_v36 = vand.u32 2147483648, %v3299_v0  ;;  %v1001_v58 = vadd.f32 %v965_v21, %v880_v53  ;;  %v1119_v54 = vsel %vm535_vm0, %v1117_v38, %v4378_v16 }
  0xaa   : > { %v1368_v42 = vadd.f32 %v2415_v41, %v1367_v37  ;;  %v1238_v25 = vrot.slane %v1178_v27, 2  ;;  %v1239_v52 = vrot.slane %v3332_v26, 2  ;;  %v489_v47 = vmul.f32 %v2946_v9, %v422_v28 }
  0xab   : > { %2420 = vpow2.f32 %v2255_v62  ;;  %v1034_v32 = vadd.f32 %v1018_v56, %v1001_v58  ;;  %v455_v37 = vmul.f32 %v2944_v8, %v2930_v3  ;;  %v611_v21 = vmul.f32 %v2948_v10, %v422_v28 }
  0xac   : > { %v1372_v44 = vsel %vm3322_vm5, %v2415_v41, %v1368_v42  ;;  %v1240_v38 = vsel %vm657_vm1, %v1238_v25, %v1239_v52  ;;  %v539_v27 = vrot.slane %v489_v47, 1  ;;  %v766_v16 = vmul.f32 %v2955_v13, %v3336_v63 }
  0xad   : > { %v2419_v62 = vpop.eup %2418  ;;  %v1377_v53 = vsel %vm3293_vm3, %v1376_v7, %v1372_v44  ;;  %v1155_v3 = vadd.f32 %v1119_v54, %v1034_v32  ;;  %v732_v56 = vmul.f32 %v2950_v11, %v2953_v12  ;;  %v661_v7 = vrot.slane %v611_v21, 2 }
  0xae   : > { %v1604_v30 = vmul.f32 %v1377_v53, %v3155_v43  ;;  %v1425_v41 = vmul.f32 %v2419_v62, %v3299_v0  ;;  %v540_v44 = vsel %vm535_vm0, %v4429_v31, %v539_v27  ;;  %v815_v28 = vrot.slane %v766_v16, 1  ;;  %v3369_v53 = vld [vmem:[%s2833_s8 + $0x40] sm:$0x3] }
  0xaf   : > { %v887_v47 = vmul.f32 %v2957_v14, %v3336_v63  ;;  %vm1430_vm7 = vweird.f32 %v2419_v62  ;;  %v1276_v43 = vadd.f32 %v1240_v38, %v1155_v3  ;;  %v593_v58 = vadd.f32 %v540_v44, %v455_v37 }
  0xb0   : > { %1656 = vmatmul.f32.vlgmr.msra.gmra.mxu0 %v1604_v30  ;;  %v1426_v42 = vsub.f32 1.0, %v1425_v41  ;;  %vm3364_vm8 = vcmp.eq.f32.partialorder %v1433_v4, 8.507059e+37  ;;  %v4432_v19 = vrot.slane %v2975_v22, 2  ;;  %v1041_v37 = vmul.f32 %v2970_v20, %v3369_v53  ;;  %vm3381_vm9 = vmor %vm1429_vm6, %vm1430_vm7 }
  0xb1   : > { %v2421_v25 = vpop.eup %2420  ;;  %v936_v21 = vrot.slane %v887_v47, 2  ;;  %v3375_v31 = vadd.f32 %v3124_v59, %v1276_v43  ;;  %v1436_v38 = vor.u32 1.1754944e-38, %v1435_v36  ;;  %v4435_v22 = vrot.slane %v2989_v29, 1 }
  0xb2   : > { %v1356_v54 = vadd.f32 1.0, %v2421_v25  ;;  %v662_v16 = vsel %vm657_vm1, %v4432_v19, %v661_v7  ;;  %v1427_v27 = vmul.f32 %v2419_v62, %v1426_v42  ;;  %v1007_v3 = vmul.f32 %v2959_v15, %v3013_v40  ;;  %v3399_v19 = vld [vmem:[%s2833_s8 + $0x58] sm:$0x3] }
  0xb3   : > { %v715_v30 = vadd.f32 %v662_v16, %v593_v58  ;;  %v816_v41 = vsel %vm535_vm0, %v4435_v22, %v815_v28  ;;  %v2259_v7 = vmul.f32 -1.442695, %v3375_v31  ;;  %v4436_v25 = vrot.slane %v2999_v34, 2 }
  0xb4   : > { %2422 = vrcp.f32 %v1356_v54  ;;  %v1428_v44 = vadd.f32 %v2419_v62, %v1427_v27  ;;  %vm1489_vm10 = vweird.f32 %v1356_v54  ;;  %v1493_v0 = vand.u32 2147483647, %v1356_v54 }
  0xb5   : > { %v748_v47 = vadd.f32 %v732_v56, %v715_v30  ;;  %v937_v42 = vsel %vm657_vm1, %v4436_v25, %v936_v21  ;;  %v1090_v36 = vrot.slane %v1041_v37, 1  ;;  %v1162_v43 = vmul.f32 %v2979_v24, %v3369_v53 }
  0xb6   : > { %v1432_v29 = vsel %vm3381_vm9, %v2419_v62, %v1428_v44  ;;  %v1495_v28 = vand.u32 2147483648, %v1356_v54  ;;  %2424 = vpow2.f32 %v2259_v7  ;;  %v459_v34 = vmul.f32 %v2944_v8, %v3013_v40 }
  0xb7   : > { %v869_v58 = vadd.f32 %v816_v41, %v748_v47  ;;  %v1437_v56 = vsel %vm3364_vm8, %v1436_v38, %v1432_v29  ;;  %v1211_v16 = vrot.slane %v1162_v43, 2  ;;  %v495_v21 = vmul.f32 %v2946_v9, %v3369_v53 }
  0xb8   : > { %v1608_v27 = vmul.f32 %v1437_v56, %v3220_v18  ;;  %v4437_v62 = vrot.slane %v3029_v48, 1  ;;  %v617_v4 = vmul.f32 %v2948_v10, %v3369_v53  ;;  %v736_v38 = vmul.f32 %v2950_v11, %v3063_v1 }
  0xb9   : > { %v990_v30 = vadd.f32 %v937_v42, %v869_v58  ;;  %v549_v32 = vrot.slane %v495_v21, 1  ;;  %v772_v41 = vmul.f32 %v2955_v13, %v3399_v19  ;;  %v893_v18 = vmul.f32 %v2957_v14, %v3399_v19 }
  0xba   : > { %v1091_v37 = vsel %vm535_vm0, %v4437_v62, %v1090_v36  ;;  %v2423_v22 = vpop.eup %2422  ;;  %1668 = vmatmul.f32.vlgmr.msra.gmra.mxu1 %v1608_v27  ;;  %v4438_v7 = vrot.slane %v3042_v55, 2  ;;  %v671_v25 = vrot.slane %v617_v4, 2  ;;  %v4439_v42 = vrot.slane %v3053_v61, 1  ;;  %v3426_v62 = vld [vmem:[%s2833_s8 + $0x70] sm:$0x3] }
  0xbb   : > { %v1485_v44 = vmul.f32 %v2423_v22, %v1356_v54  ;;  %v1023_v48 = vadd.f32 %v1007_v3, %v990_v30  ;;  %vm1490_vm11 = vweird.f32 %v2423_v22  ;;  %v825_v43 = vrot.slane %v772_v41, 1 }
  0xbc   : > { %v1212_v47 = vsel %vm657_vm1, %v4438_v7, %v1211_v16  ;;  %v550_v36 = vsel %vm535_vm0, %v4439_v42, %v549_v32  ;;  %v946_v29 = vrot.slane %v893_v18, 2  ;;  %v2425_v58 = vpop.eup %2424  ;;  %v4440_v3 = vrot.slane %v3069_v5, 2  ;;  %vm3441_vm13 = vmor %vm1489_vm10, %vm1490_vm11 }
  0xbd   : > { %v1486_v56 = vsub.f32 1.0, %v1485_v44  ;;  %v1144_v21 = vadd.f32 %v1091_v37, %v1023_v48  ;;  %v597_v27 = vadd.f32 %v550_v36, %v459_v34  ;;  %vm3431_vm12 = vcmp.eq.f32.partialorder %v1493_v0, 8.507059e+37 }
  0xbe   : > { %v672_v55 = vsel %vm657_vm1, %v4440_v3, %v671_v25  ;;  %v1496_v30 = vor.u32 1.1754944e-38, %v1495_v28  ;;  %v1360_v61 = vadd.f32 1.0, %v2425_v58  ;;  %v1047_v4 = vmul.f32 %v2970_v20, %v3426_v62 }
  0xbf   : > { %v1487_v32 = vmul.f32 %v2423_v22, %v1486_v56  ;;  %v1265_v41 = vadd.f32 %v1212_v47, %v1144_v21  ;;  %v719_v18 = vadd.f32 %v672_v55, %v597_v27  ;;  %v1168_v37 = vmul.f32 %v2979_v24, %v3426_v62 }
  0xc0   : > { %2426 = vrcp.f32 %v1360_v61  ;;  %v4445_v0 = vrot.slane %v3088_v33, 1  ;;  %v4446_v34 = vrot.slane %v3108_v49, 2  ;;  %v1011_v48 = vmul.f32 %v2959_v15, %v3103_v46 }
  0xc1   : > { %v1488_v7 = vadd.f32 %v2423_v22, %v1487_v32  ;;  %v3454_v54 = vadd.f32 %v3124_v59, %v1265_v41  ;;  %v752_v47 = vadd.f32 %v736_v38, %v719_v18  ;;  %v1100_v25 = vrot.slane %v1047_v4, 1 }
  0xc2   : > { %v826_v28 = vsel %vm535_vm0, %v4445_v0, %v825_v43  ;;  %v947_v44 = vsel %vm657_vm1, %v4446_v34, %v946_v29  ;;  %vm1549_vm14 = vweird.f32 %v1360_v61  ;;  %v1553_v42 = vand.u32 2147483647, %v1360_v61  ;;  %v3460_v29 = vld [vmem:[%s2833_s8 + $0x88] sm:$0x3] }
  0xc3   : > { %v1555_v36 = vand.u32 2147483648, %v1360_v61  ;;  %v1221_v58 = vrot.slane %v1168_v37, 2  ;;  %v1492_v33 = vsel %vm3441_vm13, %v2423_v22, %v1488_v7  ;;  %v2248_v49 = vmul.f32 -1.442695, %v3454_v54 }
  0xc4   : > { %v873_v43 = vadd.f32 %v826_v28, %v752_v47  ;;  %v463_v56 = vmul.f32 %v2944_v8, %v3103_v46  ;;  %v1497_v21 = vsel %vm3431_vm12, %v1496_v30, %v1492_v33  ;;  %v4447_v38 = vrot.slane %v3119_v57, 1  ;;  %v3484_v28 = vld [vmem:[%s2833_s8 + $0xa0] sm:$0x3] }
  0xc5   : > { %v501_v3 = vmul.f32 %v2946_v9, %v3426_v62  ;;  %v623_v22 = vmul.f32 %v2948_v10, %v3426_v62  ;;  %v1612_v55 = vmul.f32 %v1497_v21, %v3305_v39  ;;  %2428 = vpow2.f32 %v2248_v49 }
  0xc6   : > { %v1101_v27 = vsel %vm535_vm0, %v4447_v38, %v1100_v25  ;;  %v994_v4 = vadd.f32 %v947_v44, %v873_v43  ;;  %v4448_v32 = vrot.slane %v3138_v23, 2  ;;  %v2427_v30 = vpop.eup %2426  ;;  %v778_v18 = vmul.f32 %v2955_v13, %v3460_v29 }
  0xc7   : > { %v559_v41 = vrot.slane %v501_v3, 1  ;;  %v681_v57 = vrot.slane %v623_v22, 2  ;;  %v899_v37 = vmul.f32 %v2957_v14, %v3460_v29  ;;  %1680 = vmatmul.f32.vlgmr.msra.gmra.mxu2 %v1612_v55  ;;  %v1545_v5 = vmul.f32 %v2427_v30, %v1360_v61 }
  0xc8   : > { %v1222_v16 = vsel %vm657_vm1, %v4448_v32, %v1221_v58  ;;  %vm1550_vm15 = vweird.f32 %v2427_v30  ;;  %v1027_v0 = vadd.f32 %v1011_v48, %v994_v4  ;;  %v740_v39 = vmul.f32 %v2950_v11, %v3158_v45 }
  0xc9   : > { %v4449_v23 = vrot.slane %v3162_v51, 1  ;;  %v4450_v44 = vrot.slane %v3171_v60, 2  ;;  %v835_v47 = vrot.slane %v778_v18, 1  ;;  %v956_v25 = vrot.slane %v899_v37, 2  ;;  %vm3504_vm3 = vmor %vm1549_vm14, %vm1550_vm15 }
  0xca   : > { %v1546_v58 = vsub.f32 1.0, %v1545_v5  ;;  %v1148_v33 = vadd.f32 %v1101_v27, %v1027_v0  ;;  %v1053_v48 = vmul.f32 %v2970_v20, %v3484_v28  ;;  %vm3494_vm2 = vcmp.eq.f32.partialorder %v1553_v42, 8.507059e+37 }
  0xcb   : > { %v560_v34 = vsel %vm535_vm0, %v4449_v23, %v559_v41  ;;  %v682_v7 = vsel %vm657_vm1, %v4450_v44, %v681_v57  ;;  %v1556_v21 = vor.u32 1.1754944e-38, %v1555_v36  ;;  %v1015_v51 = vmul.f32 %v2959_v15, %v3200_v2  ;;  %v2429_v38 = vpop.eup %2428  ;;  %v3530_v44 = vld [vmem:[%s2833_s8 + $0xb8] sm:$0x3] }
  0xcc   : > { %v601_v49 = vadd.f32 %v560_v34, %v463_v56  ;;  %v1174_v60 = vmul.f32 %v2979_v24, %v3484_v28  ;;  %v1547_v3 = vmul.f32 %v2427_v30, %v1546_v58  ;;  %v1269_v22 = vadd.f32 %v1222_v16, %v1148_v33  ;;  %v4462_v56 = vld [vmem:[#allocation22_spill] sm:$0xff] }
  0xcd   : > { %v1110_v27 = vrot.slane %v1053_v48, 1  ;;  %v1349_v42 = vadd.f32 1.0, %v2429_v38  ;;  %v4455_v36 = vrot.slane %v3182_v17, 1  ;;  %v4456_v32 = vrot.slane %v3191_v50, 2 }
  0xce   : > { %v723_v55 = vadd.f32 %v682_v7, %v601_v49  ;;  %v507_v16 = vmul.f32 %v2946_v9, %v3484_v28  ;;  %v1548_v57 = vadd.f32 %v2427_v30, %v1547_v3  ;;  %v3517_v61 = vadd.f32 %v3124_v59, %v1269_v22  ;;  %v3536_v49 = vld [vmem:[%s2833_s8 + $0xd0] sm:$0x3] }
  0xcf   : > { %v836_v4 = vsel %vm535_vm0, %v4455_v36, %v835_v47  ;;  %v957_v41 = vsel %vm657_vm1, %v4456_v32, %v956_v25  ;;  %v629_v37 = vmul.f32 %v2948_v10, %v3484_v28  ;;  %2430 = vrcp.f32 %v1349_v42  ;;  %v4460_v3 = vld [vmem:[#allocation20_spill] sm:$0xff]  ;;  %v4464_v32 = vld [vmem:[#allocation21_spill] sm:$0xff] }
  0xd0   : > { %v756_v18 = vadd.f32 %v740_v39, %v723_v55  ;;  %v4457_v17 = vrot.slane %v3208_v35, 1  ;;  %v1231_v50 = vrot.slane %v1174_v60, 2  ;;  %v467_v0 = vmul.f32 %v2944_v8, %v3200_v2 }
  0xd1   : > { %v1552_v23 = vsel %vm3504_vm3, %v2427_v30, %v1548_v57  ;;  %vm1384_vm4 = vweird.f32 %v1349_v42  ;;  %v2252_v34 = vmul.f32 -1.442695, %v3517_v61  ;;  %v1388_v35 = vand.u32 2147483647, %v1349_v42  ;;  %v4458_v30 = vld [vmem:[#allocation18_spill] sm:$0xff] }
  0xd2   : > { %v1111_v5 = vsel %vm535_vm0, %v4457_v17, %v1110_v27  ;;  %v877_v39 = vadd.f32 %v836_v4, %v756_v18  ;;  %v1557_v7 = vsel %vm3494_vm2, %v1556_v21, %v1552_v23  ;;  %v1390_v47 = vand.u32 2147483648, %v1349_v42 }
  0xd3   : > { %v569_v25 = vrot.slane %v507_v16, 1  ;;  %v1616_v58 = vmul.f32 %v1557_v7, %v3375_v31  ;;  %2432 = vpow2.f32 %v2252_v34  ;;  %v691_v48 = vrot.slane %v629_v37, 2 }
  0xd4   : > { %v998_v33 = vadd.f32 %v957_v41, %v877_v39  ;;  %v4459_v60 = vrot.slane %v4458_v30, 2  ;;  %v4461_v22 = vrot.slane %v4460_v3, 1  ;;  %v784_v43 = vmul.f32 %v2955_v13, %v3530_v44  ;;  %v4467_v39 = vld [vmem:[#allocation24_spill] sm:$0xff] }
  0xd5   : > { %v905_v21 = vmul.f32 %v2957_v14, %v3530_v44  ;;  %1692 = vmatmul.f32.vlgmr.msra.gmra.mxu3 %v1616_v58  ;;  %v4463_v36 = vrot.slane %v4462_v56, 2  ;;  %v744_v41 = vmul.f32 %v2950_v11, %v4464_v32  ;;  %v2431_v16 = vpop.eup %2430  ;;  %v1059_v37 = vmul.f32 %v2970_v20, %v3536_v49 }
  0xd6   : > { %v1232_v38 = vsel %vm657_vm1, %v4459_v60, %v1231_v50  ;;  %v570_v55 = vsel %vm535_vm0, %v4461_v22, %v569_v25  ;;  %v1031_v31 = vadd.f32 %v1015_v51, %v998_v33  ;;  %v845_v57 = vrot.slane %v784_v43, 1 }
  0xd7   : > { %v605_v27 = vadd.f32 %v570_v55, %v467_v0  ;;  %v692_v4 = vsel %vm657_vm1, %v4463_v36, %v691_v48  ;;  %v966_v18 = vrot.slane %v905_v21, 2  ;;  %v1180_v17 = vmul.f32 %v2979_v24, %v3536_v49  ;;  %v4469_v55 = vld [vmem:[#allocation25_spill] sm:$0xff]  ;;  %v4471_v21 = vld [vmem:[#allocation26_spill] sm:$0xff] }
  0xd8   : > { %v1380_v50 = vmul.f32 %v2431_v16, %v1349_v42  ;;  %vm3557_vm5 = vcmp.eq.f32.partialorder %v1388_v35, 8.507059e+37  ;;  %v1152_v0 = vadd.f32 %v1111_v5, %v1031_v31  ;;  %v1391_v34 = vor.u32 1.1754944e-38, %v1390_v47  ;;  %v4472_v47 = vld [vmem:[#allocation12_spill] sm:$0xff] }
  0xd9   : > { %v727_v23 = vadd.f32 %v692_v4, %v605_v27  ;;  %v4468_v7 = vrot.slane %v4467_v39, 1  ;;  %v1120_v58 = vrot.slane %v1059_v37, 1  ;;  %v1241_v33 = vrot.slane %v1180_v17, 2  ;;  %v2433_v48 = vpop.eup %2432 }
  0xda   : > { %v1381_v30 = vsub.f32 1.0, %v1380_v50  ;;  %vm1385_vm6 = vweird.f32 %v2431_v16  ;;  %v1273_v60 = vadd.f32 %v1232_v38, %v1152_v0  ;;  %v1353_v22 = vadd.f32 1.0, %v2433_v48 }
  0xdb   : > { %v846_v25 = vsel %vm535_vm0, %v4468_v7, %v845_v57  ;;  %v760_v3 = vadd.f32 %v744_v41, %v727_v23  ;;  %v4470_v35 = vrot.slane %v4469_v55, 2  ;;  %v1019_v5 = vmul.f32 %v2959_v15, %v4471_v21  ;;  %vm3579_vm7 = vmor %vm1384_vm4, %vm1385_vm6 }
  0xdc   : > { %v490_v31 = vmul.f32 %v2946_v9, %v4472_v47  ;;  %v1382_v27 = vmul.f32 %v2431_v16, %v1381_v30  ;;  %v3572_v56 = vadd.f32 %v3124_v59, %v1273_v60  ;;  %v3576_v38 = vmul.f32 %v2946_v9, %v2953_v12  ;;  %v4476_v30 = vld [vmem:[#allocation13_spill] sm:$0xff] }
  0xdd   : > { %v967_v43 = vsel %vm657_vm1, %v4470_v35, %v966_v18  ;;  %v881_v36 = vadd.f32 %v846_v25, %v760_v3  ;;  %2434 = vrcp.f32 %v1353_v22  ;;  %v4475_v41 = vrot.slane %v3309_v6, 1 }
  0xde   : > { %v1242_v18 = vsel %vm657_vm1, %v1239_v52, %v1241_v33  ;;  %v456_v37 = vmul.f32 %v2944_v8, %v4472_v47  ;;  %v1383_v17 = vadd.f32 %v2431_v16, %v1382_v27  ;;  %vm1444_vm8 = vweird.f32 %v1353_v22 }
  0xdf   : > { %v1121_v57 = vsel %vm535_vm0, %v4475_v41, %v1120_v58  ;;  %v2256_v42 = vmul.f32 -1.442695, %v3572_v56  ;;  %v1002_v50 = vadd.f32 %v967_v43, %v881_v36  ;;  %v541_v0 = vrot.slane %v490_v31, 1 }
  0xe0   : > { %v1448_v23 = vand.u32 2147483647, %v1353_v22  ;;  %v1450_v39 = vand.u32 2147483648, %v1353_v22  ;;  %v4395_v7 = vrot.slane %v3576_v38, 1  ;;  %v612_v6 = vmul.f32 %v2948_v10, %v4472_v47 }
  0xe1   : > { %v1387_v26 = vsel %vm3579_vm7, %v2431_v16, %v1383_v17  ;;  %2436 = vpow2.f32 %v2256_v42  ;;  %v1035_v52 = vadd.f32 %v1019_v5, %v1002_v50  ;;  %v3599_v25 = vmul.f32 %v2948_v10, %v2953_v12 }
  0xe2   : > { %v1392_v58 = vsel %vm3557_vm5, %v1391_v34, %v1387_v26  ;;  %v543_v33 = vsel %vm535_vm0, %v541_v0, %v4395_v7  ;;  %v663_v48 = vrot.slane %v612_v6, 2  ;;  %v733_v60 = vmul.f32 %v2950_v11, %v4476_v30 }
  0xe3   : > { %v1605_v3 = vmul.f32 %v1392_v58, %v3454_v54  ;;  %v1156_v16 = vadd.f32 %v1121_v57, %v1035_v52  ;;  %v594_v55 = vadd.f32 %v543_v33, %v456_v37  ;;  %v4394_v35 = vrot.slane %v3599_v25, 2  ;;  %v2435_v43 = vpop.eup %2434 }
  0xe4   : > { %v767_v12 = vmul.f32 %v2955_v13, %v4476_v30  ;;  %v3614_v51 = vmul.f32 %v2955_v13, %v3013_v40  ;;  %v888_v34 = vmul.f32 %v2957_v14, %v4476_v30  ;;  %v3620_v5 = vmul.f32 %v2957_v14, %v3013_v40 }
  0xe5   : > { %1659 = vmatmul.f32.gmra.mxu0 %v1605_v3  ;;  %v1440_v54 = vmul.f32 %v2435_v43, %v1353_v22  ;;  %vm3622_vm9 = vcmp.eq.f32.partialorder %v1448_v23, 8.507059e+37  ;;  %v1277_v31 = vadd.f32 %v1242_v18, %v1156_v16  ;;  %v665_v27 = vsel %vm657_vm1, %v663_v48, %v4394_v35  ;;  %v4479_v23 = vld [vmem:[#allocation14_spill] sm:$0xff] }
  0xe6   : > { %v716_v36 = vadd.f32 %v665_v27, %v594_v55  ;;  %v817_v4 = vrot.slane %v767_v12, 1  ;;  %v4388_v41 = vrot.slane %v3614_v51, 1  ;;  %v938_v57 = vrot.slane %v888_v34, 2 }
  0xe7   : > { %v2437_v37 = vpop.eup %2436  ;;  %v1441_v17 = vsub.f32 1.0, %v1440_v54  ;;  %vm1445_vm10 = vweird.f32 %v2435_v43  ;;  %v3631_v40 = vadd.f32 %v3124_v59, %v1277_v31  ;;  %v4387_v42 = vrot.slane %v3620_v5, 2 }
  0xe8   : > { %v1357_v50 = vadd.f32 1.0, %v2437_v37  ;;  %v749_v0 = vadd.f32 %v733_v60, %v716_v36  ;;  %v819_v18 = vsel %vm535_vm0, %v817_v4, %v4388_v41  ;;  %v1042_v6 = vmul.f32 %v2970_v20, %v4479_v23  ;;  %vm3645_vm11 = vmor %vm1444_vm8, %vm1445_vm10 }
  0xe9   : > { %v1442_v26 = vmul.f32 %v2435_v43, %v1441_v17  ;;  %v1451_v52 = vor.u32 1.1754944e-38, %v1450_v39  ;;  %v2260_v58 = vmul.f32 -1.442695, %v3631_v40  ;;  %v3642_v33 = vmul.f32 %v2970_v20, %v3063_v1 }
  0xea   : > { %2438 = vrcp.f32 %v1357_v50  ;;  %v1508_v30 = vand.u32 2147483647, %v1357_v50  ;;  %v940_v60 = vsel %vm657_vm1, %v938_v57, %v4387_v42  ;;  %v1008_v39 = vmul.f32 %v2959_v15, %v4479_v23 }
  0xeb   : > { %v1443_v3 = vadd.f32 %v2435_v43, %v1442_v26  ;;  %2440 = vpow2.f32 %v2260_v58  ;;  %v870_v16 = vadd.f32 %v819_v18, %v749_v0  ;;  %v1092_v55 = vrot.slane %v1042_v6, 1 }
  0xec   : > { %vm1504_vm12 = vweird.f32 %v1357_v50  ;;  %v4385_v22 = vrot.slane %v3642_v33, 1  ;;  %v1163_v12 = vmul.f32 %v2979_v24, %v4479_v23  ;;  %v1510_v54 = vand.u32 2147483648, %v1357_v50 }
  0xed   : > { %v1447_v34 = vsel %vm3645_vm11, %v2435_v43, %v1443_v3  ;;  %v991_v31 = vadd.f32 %v940_v60, %v870_v16  ;;  %v3661_v27 = vmul.f32 %v2979_v24, %v3063_v1  ;;  %v496_v37 = vmul.f32 %v2946_v9, %v4479_v23 }
  0xee   : > { %v1452_v36 = vsel %vm3622_vm9, %v1451_v52, %v1447_v34  ;;  %v1094_v4 = vsel %vm535_vm0, %v1092_v55, %v4385_v22  ;;  %v1213_v57 = vrot.slane %v1163_v12, 2  ;;  %vm3671_vm13 = vcmp.eq.f32.partialorder %v1508_v30, 8.507059e+37  ;;  %v4490_v22 = vld [vmem:[#allocation17_spill] sm:$0xff] }
  0xef   : > { %v1609_v17 = vmul.f32 %v1452_v36, %v3517_v61  ;;  %v1024_v0 = vadd.f32 %v1008_v39, %v991_v31  ;;  %v4379_v18 = vrot.slane %v3661_v27, 2  ;;  %v3678_v47 = vmul.f32 %v2946_v9, %v3063_v1 }
  0xf0   : > { %v2439_v6 = vpop.eup %2438  ;;  %v460_v26 = vmul.f32 %v2944_v8, %v4479_v23  ;;  %v551_v52 = vrot.slane %v496_v37, 1  ;;  %v618_v58 = vmul.f32 %v2948_v10, %v4479_v23  ;;  %v3686_v61 = vmul.f32 %v2948_v10, %v3063_v1  ;;  %v4484_v1 = vld [vmem:[#allocation15_spill] sm:$0xff] }
  0xf1   : > { %v2441_v48 = vpop.eup %2440  ;;  %1671 = vmatmul.f32.gmra.mxu1 %v1609_v17  ;;  %v1500_v30 = vmul.f32 %v2439_v6, %v1357_v50  ;;  %vm1505_vm14 = vweird.f32 %v2439_v6  ;;  %v1145_v60 = vadd.f32 %v1094_v4, %v1024_v0  ;;  %v1215_v39 = vsel %vm657_vm1, %v1213_v57, %v4379_v18 }
  0xf2   : > { %v3691_v3 = vadd.f32 1.0, %v2441_v48  ;;  %v4381_v16 = vrot.slane %v3678_v47, 1  ;;  %v673_v55 = vrot.slane %v618_v58, 2  ;;  %v4380_v23 = vrot.slane %v3686_v61, 2  ;;  %vm3717_vm2 = vmor %vm1504_vm12, %vm1505_vm14 }
  0xf3   : > { %v1501_v12 = vsub.f32 1.0, %v1500_v30  ;;  %v1266_v34 = vadd.f32 %v1215_v39, %v1145_v60  ;;  %v773_v31 = vmul.f32 %v2955_v13, %v4484_v1  ;;  %v3699_v36 = vmul.f32 %v2955_v13, %v3103_v46 }
  0xf4   : > { %v1511_v4 = vor.u32 1.1754944e-38, %v1510_v54  ;;  %2442 = vrcp.f32 %v3691_v3  ;;  %v1570_v57 = vand.u32 2147483648, %v3691_v3  ;;  %v737_v37 = vmul.f32 %v2950_v11, %v4484_v1 }
  0xf5   : > { %v1502_v17 = vmul.f32 %v2439_v6, %v1501_v12  ;;  %vm1564_vm15 = vweird.f32 %v3691_v3  ;;  %v3707_v0 = vadd.f32 %v3124_v59, %v1266_v34  ;;  %v553_v58 = vsel %vm535_vm0, %v551_v52, %v4381_v16 }
  0xf6   : > { %v675_v54 = vsel %vm657_vm1, %v673_v55, %v4380_v23  ;;  %v1568_v30 = vand.u32 2147483647, %v3691_v3  ;;  %v1571_v60 = vor.u32 1.1754944e-38, %v1570_v57  ;;  %v598_v39 = vadd.f32 %v553_v58, %v460_v26  ;;  %v4487_v23 = vld [vmem:[#allocation16_spill] sm:$0xff] }
  0xf7   : > { %v827_v59 = vrot.slane %v773_v31, 1  ;;  %v1503_v12 = vadd.f32 %v2439_v6, %v1502_v17  ;;  %v2249_v34 = vmul.f32 -1.442695, %v3707_v0  ;;  %v4384_v52 = vrot.slane %v3699_v36, 1 }
  0xf8   : > { %v894_v18 = vmul.f32 %v2957_v14, %v4484_v1  ;;  %v720_v55 = vadd.f32 %v675_v54, %v598_v39  ;;  %v3728_v50 = vmul.f32 %v2957_v14, %v3103_v46  ;;  %v1012_v16 = vmul.f32 %v2959_v15, %v4487_v23 }
  0xf9   : > { %v1048_v26 = vmul.f32 %v2970_v20, %v4487_v23  ;;  %v1507_v31 = vsel %vm3717_vm2, %v2439_v6, %v1503_v12  ;;  %2444 = vpow2.f32 %v2249_v34  ;;  %v829_v57 = vsel %vm535_vm0, %v827_v59, %v4384_v52 }
  0xfa   : > { %v948_v1 = vrot.slane %v894_v18, 2  ;;  %v2443_v17 = vpop.eup %2442  ;;  %v1512_v46 = vsel %vm3671_vm13, %v1511_v4, %v1507_v31  ;;  %v753_v58 = vadd.f32 %v737_v37, %v720_v55  ;;  %v4382_v54 = vrot.slane %v3728_v50, 2 }
  0xfb   : > { %v3744_v39 = vmul.f32 %v2970_v20, %v3158_v45  ;;  %v1613_v48 = vmul.f32 %v1512_v46, %v3572_v56  ;;  %v1560_v6 = vmul.f32 %v2443_v17, %v3691_v3  ;;  %vm1565_vm3 = vweird.f32 %v2443_v17 }
  0xfc   : > { %v1102_v12 = vrot.slane %v1048_v26, 1  ;;  %v874_v34 = vadd.f32 %v829_v57, %v753_v58  ;;  %v950_v18 = vsel %vm657_vm1, %v948_v1, %v4382_v54  ;;  %v1169_v4 = vmul.f32 %v2979_v24, %v4487_v23  ;;  %vm3775_vm4 = vmor %vm1564_vm15, %vm1565_vm3 }
  0xfd   : > { %v4383_v43 = vrot.slane %v3744_v39, 1  ;;  %1683 = vmatmul.f32.gmra.mxu2 %v1613_v48  ;;  %v1561_v37 = vsub.f32 1.0, %v1560_v6  ;;  %v3756_v59 = vmul.f32 %v2979_v24, %v3158_v45  ;;  %v464_v56 = vmul.f32 %v2944_v8, %v4487_v23 }
  0xfe   : > { %v502_v55 = vmul.f32 %v2946_v9, %v4487_v23  ;;  %v995_v26 = vadd.f32 %v950_v18, %v874_v34  ;;  %v1223_v57 = vrot.slane %v1169_v4, 2  ;;  %v3767_v1 = vmul.f32 %v2946_v9, %v3158_v45  ;;  %v4493_v34 = vld [vmem:[#allocation19_spill] sm:$0xff] }
  0xff   : > { %v1104_v31 = vsel %vm535_vm0, %v1102_v12, %v4383_v43  ;;  %v2445_v46 = vpop.eup %2444  ;;  %v1562_v58 = vmul.f32 %v2443_v17, %v1561_v37  ;;  %v4386_v48 = vrot.slane %v3756_v59, 2  ;;  %v624_v54 = vmul.f32 %v2948_v10, %v4487_v23 }
 0x100   : > { %v561_v6 = vrot.slane %v502_v55, 1  ;;  %v1350_v12 = vadd.f32 1.0, %v2445_v46  ;;  %v1028_v18 = vadd.f32 %v1012_v16, %v995_v26  ;;  %v4390_v4 = vrot.slane %v3767_v1, 1 }
 0x101   : > { %v3782_v37 = vmul.f32 %v2948_v10, %v3158_v45  ;;  %v1563_v43 = vadd.f32 %v2443_v17, %v1562_v58  ;;  %vm1569_vm5 = vcmp.eq.f32.partialorder %v1568_v30, 8.507059e+37  ;;  %v1225_v23 = vsel %vm657_vm1, %v1223_v57, %v4386_v48 }
 0x102   : > { %v683_v55 = vrot.slane %v624_v54, 2  ;;  %2446 = vrcp.f32 %v1350_v12  ;;  %v1403_v3 = vand.u32 2147483647, %v1350_v12  ;;  %v1405_v52 = vand.u32 2147483648, %v1350_v12 }
 0x103   : > { %v741_v46 = vmul.f32 %v2950_v11, %v4490_v22  ;;  %v1567_v16 = vsel %vm3775_vm4, %v2443_v17, %v1563_v43  ;;  %v1149_v26 = vadd.f32 %v1104_v31, %v1028_v18  ;;  %v563_v45 = vsel %vm535_vm0, %v561_v6, %v4390_v4 }
 0x104   : > { %v4389_v30 = vrot.slane %v3782_v37, 2  ;;  %v1572_v58 = vsel %vm1569_vm5, %v1571_v60, %v1567_v16  ;;  %vm1399_vm6 = vweird.f32 %v1350_v12  ;;  %v1406_v57 = vor.u32 1.1754944e-38, %v1405_v52 }
 0x105   : > { %v602_v54 = vadd.f32 %v563_v45, %v464_v56  ;;  %v1617_v48 = vmul.f32 %v1572_v58, %v3631_v40  ;;  %v1270_v42 = vadd.f32 %v1225_v23, %v1149_v26  ;;  %v779_v17 = vmul.f32 %v2955_v13, %v4490_v22 }
 0x106   : > { %v685_v41 = vsel %vm657_vm1, %v683_v55, %v4389_v30  ;;  %v3803_v31 = vmul.f32 %v2955_v13, %v3200_v2  ;;  %v900_v60 = vmul.f32 %v2957_v14, %v4490_v22  ;;  %v3809_v52 = vmul.f32 %v2957_v14, %v3200_v2 }
 0x107   : > { %v724_v43 = vadd.f32 %v685_v41, %v602_v54  ;;  %1695 = vmatmul.f32.gmra.mxu3 %v1617_v48  ;;  %vm3811_vm7 = vcmp.eq.f32.partialorder %v1403_v3, 8.507059e+37  ;;  %v3818_v41 = vld [vmem:[%s4324_s2] ss:$0 sm:$0xff]  ;;  %v837_v6 = vrot.slane %v779_v17, 1  ;;  %v1016_v22 = vmul.f32 %v2959_v15, %v4493_v34 }
 0x108   : > { %v3821_v56 = vadd.f32 %v3818_v41, %v1270_v42  ;;  %v1054_v2 = vmul.f32 %v2970_v20, %v4493_v34  ;;  %v2447_v48 = vpop.eup %2446  ;;  %v4393_v23 = vrot.slane %v3803_v31, 1  ;;  %v958_v55 = vrot.slane %v900_v60, 2 }
 0x109   : > { %v757_v18 = vadd.f32 %v741_v46, %v724_v43  ;;  %v4391_v3 = vrot.slane %v3809_v52, 2  ;;  %v1395_v16 = vmul.f32 %v2447_v48, %v1350_v12  ;;  %vm1400_vm8 = vweird.f32 %v2447_v48 }
 0x10a   : > { %v2253_v26 = vmul.f32 -1.442695, %v3821_v56  ;;  %v3832_v42 = vmul.f32 %v2970_v20, %v4464_v32  ;;  %v839_v45 = vsel %vm535_vm0, %v837_v6, %v4393_v23  ;;  %v1112_v58 = vrot.slane %v1054_v2, 1  ;;  %vm3860_vm9 = vmor %vm1399_vm6, %vm1400_vm8  ;;  %v4497_v23 = vld [vmem:[#allocation23_spill] sm:$0xff] }
 0x10b   : > { %v960_v46 = vsel %vm657_vm1, %v958_v55, %v4391_v3  ;;  %v1175_v54 = vmul.f32 %v2979_v24, %v4493_v34  ;;  %v1396_v17 = vsub.f32 1.0, %v1395_v16  ;;  %v878_v43 = vadd.f32 %v839_v45, %v757_v18 }
 0x10c   : > { %2448 = vpow2.f32 %v2253_v26  ;;  %v4392_v60 = vrot.slane %v3832_v42, 1  ;;  %v3845_v30 = vmul.f32 %v2979_v24, %v4464_v32  ;;  %v468_v6 = vmul.f32 %v2944_v8, %v4493_v34 }
 0x10d   : > { %v1233_v4 = vrot.slane %v1175_v54, 2  ;;  %v508_v55 = vmul.f32 %v2946_v9, %v4493_v34  ;;  %v1397_v2 = vmul.f32 %v2447_v48, %v1396_v17  ;;  %v999_v3 = vadd.f32 %v960_v46, %v878_v43 }
 0x10e   : > { %4494 = vst [vmem:[#allocation18_spill] sm:$0xff] %v3845_v30  ;;  %v1114_v16 = vsel %vm535_vm0, %v1112_v58, %v4392_v60  ;;  %v3856_v18 = vmul.f32 %v2946_v9, %v4464_v32  ;;  %v4396_v45 = vrot.slane %v3845_v30, 2  ;;  %v630_v46 = vmul.f32 %v2948_v10, %v4493_v34 }
 0x10f   : > { %v571_v54 = vrot.slane %v508_v55, 1  ;;  %v3869_v17 = vmul.f32 %v2948_v10, %v4464_v32  ;;  %v1398_v58 = vadd.f32 %v2447_v48, %v1397_v2  ;;  %v1032_v43 = vadd.f32 %v1016_v22, %v999_v3 }
 0x110   : > { %v4399_v60 = vrot.slane %v3856_v18, 1  ;;  %v745_v12 = vmul.f32 %v2950_v11, %v4497_v23  ;;  %v1235_v35 = vsel %vm657_vm1, %v1233_v4, %v4396_v45  ;;  %v693_v7 = vrot.slane %v630_v46, 2 }
 0x111   : > { %v785_v34 = vmul.f32 %v2955_v13, %v4497_v23  ;;  %v1402_v22 = vsel %vm3860_vm9, %v2447_v48, %v1398_v58  ;;  %v1153_v3 = vadd.f32 %v1114_v16, %v1032_v43  ;;  %v3887_v4 = vmul.f32 %v2955_v13, %v4471_v21  ;;  %v447_v43 = vld [vmem:[%s2833_s8 + $0xd8] sm:$0xff] }
 0x112   : > { %v2449_v32 = vpop.eup %2448  ;;  %v573_v2 = vsel %vm535_vm0, %v571_v54, %v4399_v60  ;;  %v1407_v46 = vsel %vm3811_vm7, %v1406_v57, %v1402_v22  ;;  %v4498_v30 = vrot.slane %v3869_v17, 2  ;;  %v3904_v57 = vld [vmem:[%s2833_s8 + $0xe0] sm:$0xff] }
 0x113   : > { %v3891_v45 = vadd.f32 1.0, %v2449_v32  ;;  %v606_v55 = vadd.f32 %v573_v2, %v468_v6  ;;  %v1606_v16 = vmul.f32 %v1407_v46, %v3707_v0  ;;  %v1274_v26 = vadd.f32 %v1235_v35, %v1153_v3  ;;  %4499 = vst [vmem:[#allocation20_spill] sm:$0xff] %v3904_v57 }
 0x114   : > { %v695_v48 = vsel %vm657_vm1, %v693_v7, %v4498_v30  ;;  %v847_v58 = vrot.slane %v785_v34, 1  ;;  %v4398_v54 = vrot.slane %v3887_v4, 1  ;;  %v906_v32 = vmul.f32 %v2957_v14, %v4497_v23 }
 0x115   : > { %2450 = vrcp.f32 %v3891_v45  ;;  %1662 = vmatmul.f32.gmra.mxu0 %v1606_v16  ;;  %v3901_v40 = vadd.f32 %v3818_v41, %v1274_v26  ;;  %v728_v6 = vadd.f32 %v695_v48, %v606_v55  ;;  %vm1459_vm10 = vweird.f32 %v3891_v45 }
 0x116   : > { %v1463_v7 = vand.u32 2147483647, %v3891_v45  ;;  %v849_v35 = vsel %vm535_vm0, %v847_v58, %v4398_v54  ;;  %v3915_v0 = vmul.f32 %v2957_v14, %v4471_v21  ;;  %v968_v22 = vrot.slane %v906_v32, 2 }
 0x117   : > { %v2257_v30 = vmul.f32 -1.442695, %v3901_v40  ;;  %v761_v34 = vadd.f32 %v745_v12, %v728_v6  ;;  %v1060_v55 = vmul.f32 %v2970_v20, %v447_v43  ;;  %v3922_v3 = vmul.f32 %v2970_v20, %v3904_v57 }
 0x118   : > { %4500 = vst [vmem:[#allocation22_spill] sm:$0xff] %v3915_v0  ;;  %v4401_v23 = vrot.slane %v3915_v0, 2  ;;  %v1181_v2 = vmul.f32 %v2979_v24, %v447_v43  ;;  %v3927_v46 = vmul.f32 %v2979_v24, %v3904_v57  ;;  %v1020_v12 = vmul.f32 %v2959_v15, %v447_v43 }
 0x119   : > { %2452 = vpow2.f32 %v2257_v30  ;;  %v882_v21 = vadd.f32 %v849_v35, %v761_v34  ;;  %v1122_v48 = vrot.slane %v1060_v55, 1  ;;  %v4403_v58 = vrot.slane %v3922_v3, 1  ;;  %v2541_v30 = vld [vmem:[%s2833_s8 + $0x20] sm:$0xff] }
 0x11a   : > { %4501 = vst [vmem:[#allocation21_spill] sm:$0xff] %v3927_v46  ;;  %v970_v26 = vsel %vm657_vm1, %v968_v22, %v4401_v23  ;;  %v1243_v6 = vrot.slane %v1181_v2, 2  ;;  %v4404_v32 = vrot.slane %v3927_v46, 2  ;;  %v1465_v60 = vand.u32 2147483648, %v3891_v45 }
 0x11b   : > { %v2451_v16 = vpop.eup %2450  ;;  %v1003_v57 = vadd.f32 %v970_v26, %v882_v21  ;;  %v492_v35 = vmul.f32 %v2946_v9, %v3336_v63  ;;  %v1124_v43 = vsel %vm535_vm0, %v1122_v48, %v4403_v58  ;;  %v457_v34 = vmul.f32 %v2541_v30, %v2944_v8 }
 0x11c   : > { %v1455_v54 = vmul.f32 %v2451_v16, %v3891_v45  ;;  %vm1460_vm11 = vweird.f32 %v2451_v16  ;;  %v614_v22 = vmul.f32 %v2948_v10, %v3336_v63  ;;  %v769_v21 = vmul.f32 %v2955_v13, %v3369_v53 }
 0x11d   : > { %v1036_v2 = vadd.f32 %v1020_v12, %v1003_v57  ;;  %v544_v23 = vrot.slane %v492_v35, 1  ;;  %v1245_v26 = vsel %vm657_vm1, %v1243_v6, %v4404_v32  ;;  %v890_v48 = vmul.f32 %v2957_v14, %v3369_v53  ;;  %vm3961_vm12 = vmor %vm1459_vm10, %vm1460_vm11 }
 0x11e   : > { %v1456_v55 = vsub.f32 1.0, %v1455_v54  ;;  %v666_v0 = vrot.slane %v614_v22, 2  ;;  %v1044_v30 = vmul.f32 %v2970_v20, %v3399_v19  ;;  %v1466_v54 = vor.u32 1.1754944e-38, %v1465_v60 }
 0x11f   : > { %v2453_v58 = vpop.eup %2452  ;;  %v1157_v57 = vadd.f32 %v1124_v43, %v1036_v2  ;;  %v4502_v12 = vrot.slane %v3576_v38, 1  ;;  %v4505_v32 = vrot.slane %v3599_v25, 2  ;;  %v820_v60 = vrot.slane %v769_v21, 1  ;;  %v2542_v2 = vld [vmem:[%s2833_s8 + $0x38] sm:$0xff] }
 0x120   : > { %v1457_v63 = vmul.f32 %v2451_v16, %v1456_v55  ;;  %v3965_v53 = vadd.f32 1.0, %v2453_v58  ;;  %vm1464_vm13 = vcmp.eq.f32.partialorder %v1463_v7, 8.507059e+37  ;;  %v941_v45 = vrot.slane %v890_v48, 2 }
 0x121   : > { %v545_v35 = vsel %vm535_vm0, %v4502_v12, %v544_v23  ;;  %v667_v55 = vsel %vm657_vm1, %v4505_v32, %v666_v0  ;;  %v1278_v38 = vadd.f32 %v1245_v26, %v1157_v57  ;;  %v734_v23 = vmul.f32 %v2542_v2, %v2950_v11  ;;  %v2543_v12 = vld [vmem:[%s2833_s8 + $0x50] sm:$0xff] }
 0x122   : > { %v595_v22 = vadd.f32 %v545_v35, %v457_v34  ;;  %v1458_v43 = vadd.f32 %v2451_v16, %v1457_v63  ;;  %2454 = vrcp.f32 %v3965_v53  ;;  %v1009_v46 = vmul.f32 %v2543_v12, %v2959_v15 }
 0x123   : > { %v1095_v58 = vrot.slane %v1044_v30, 1  ;;  %v1523_v25 = vand.u32 2147483647, %v3965_v53  ;;  %v3979_v0 = vadd.f32 %v3818_v41, %v1278_v38  ;;  %vm1519_vm14 = vweird.f32 %v3965_v53 }
 0x124   : > { %v1462_v34 = vsel %vm3961_vm12, %v2451_v16, %v1458_v43  ;;  %v717_v7 = vadd.f32 %v667_v55, %v595_v22  ;;  %v1525_v21 = vand.u32 2147483648, %v3965_v53  ;;  %v4506_v26 = vrot.slane %v3614_v51, 1 }
 0x125   : > { %v1467_v32 = vsel %vm1464_vm13, %v1466_v54, %v1462_v34  ;;  %v2261_v63 = vmul.f32 -1.442695, %v3979_v0  ;;  %v1165_v57 = vmul.f32 %v2979_v24, %v3399_v19  ;;  %v4507_v35 = vrot.slane %v3620_v5, 2  ;;  %v2544_v34 = vld [vmem:[%s2833_s8 + $0x68] sm:$0xff] }
 0x126   : > { %v821_v48 = vsel %vm535_vm0, %v4506_v26, %v820_v60  ;;  %v1610_v30 = vmul.f32 %v1467_v32, %v3821_v56  ;;  %v750_v16 = vadd.f32 %v734_v23, %v717_v7  ;;  %v4508_v6 = vrot.slane %v3642_v33, 1 }
 0x127   : > { %v942_v54 = vsel %vm657_vm1, %v4507_v35, %v941_v45  ;;  %v498_v51 = vmul.f32 %v2946_v9, %v3399_v19  ;;  %v620_v56 = vmul.f32 %v2948_v10, %v3399_v19  ;;  %vm4000_vm15 = vcmp.eq.f32.partialorder %v1523_v25, 8.507059e+37 }
 0x128   : > { %v1096_v22 = vsel %vm535_vm0, %v4508_v6, %v1095_v58  ;;  %1674 = vmatmul.f32.gmra.mxu1 %v1610_v30  ;;  %2456 = vpow2.f32 %v2261_v63  ;;  %v871_v5 = vadd.f32 %v821_v48, %v750_v16  ;;  %v461_v60 = vmul.f32 %v2543_v12, %v2944_v8  ;;  %v2455_v43 = vpop.eup %2454 }
 0x129   : > { %v775_v33 = vmul.f32 %v2955_v13, %v3426_v62  ;;  %v1216_v38 = vrot.slane %v1165_v57, 2  ;;  %v554_v2 = vrot.slane %v498_v51, 1  ;;  %v676_v23 = vrot.slane %v620_v56, 2 }
 0x12a   : > { %v896_v45 = vmul.f32 %v2957_v14, %v3426_v62  ;;  %v1515_v19 = vmul.f32 %v2455_v43, %v3965_v53  ;;  %vm1520_vm2 = vweird.f32 %v2455_v43  ;;  %v992_v58 = vadd.f32 %v942_v54, %v871_v5 }
 0x12b   : > { %v738_v25 = vmul.f32 %v2544_v34, %v2950_v11  ;;  %v4511_v12 = vrot.slane %v3678_v47, 1  ;;  %v4512_v32 = vrot.slane %v3686_v61, 2  ;;  %v830_v48 = vrot.slane %v775_v33, 1  ;;  %v2545_v47 = vld [vmem:[%s2833_s8 + $0x80] sm:$0xff]  ;;  %vm4030_vm3 = vmor %vm1519_vm14, %vm1520_vm2 }
 0x12c   : > { %v951_v30 = vrot.slane %v896_v45, 2  ;;  %v1516_v63 = vsub.f32 1.0, %v1515_v19  ;;  %v1025_v62 = vadd.f32 %v1009_v46, %v992_v58  ;;  %v1050_v57 = vmul.f32 %v2970_v20, %v3460_v29 }
 0x12d   : > { %v555_v7 = vsel %vm535_vm0, %v4511_v12, %v554_v2  ;;  %v677_v26 = vsel %vm657_vm1, %v4512_v32, %v676_v23  ;;  %v1526_v35 = vor.u32 1.1754944e-38, %v1525_v21  ;;  %v4513_v54 = vrot.slane %v3661_v27, 2 }
 0x12e   : > { %v599_v16 = vadd.f32 %v555_v7, %v461_v60  ;;  %v1013_v51 = vmul.f32 %v2545_v47, %v2959_v15  ;;  %v1171_v61 = vmul.f32 %v2979_v24, %v3460_v29  ;;  %v2457_v56 = vpop.eup %2456  ;;  %v1517_v5 = vmul.f32 %v2455_v43, %v1516_v63 }
 0x12f   : > { %v1217_v6 = vsel %vm657_vm1, %v4513_v54, %v1216_v38  ;;  %v1146_v33 = vadd.f32 %v1096_v22, %v1025_v62  ;;  %v1105_v46 = vrot.slane %v1050_v57, 1  ;;  %v1362_v27 = vadd.f32 1.0, %v2457_v56 }
 0x130   : > { %v721_v2 = vadd.f32 %v677_v26, %v599_v16  ;;  %v4516_v60 = vrot.slane %v3699_v36, 1  ;;  %v4517_v23 = vrot.slane %v3728_v50, 2  ;;  %v504_v22 = vmul.f32 %v2946_v9, %v3460_v29 }
 0x131   : > { %v1518_v19 = vadd.f32 %v2455_v43, %v1517_v5  ;;  %v1267_v58 = vadd.f32 %v1217_v6, %v1146_v33  ;;  %v626_v53 = vmul.f32 %v2948_v10, %v3460_v29  ;;  %2458 = vrcp.f32 %v1362_v27  ;;  %v2546_v6 = vld [vmem:[%s2833_s8 + $0x98] sm:$0xff] }
 0x132   : > { %v831_v38 = vsel %vm535_vm0, %v4516_v60, %v830_v48  ;;  %v952_v45 = vsel %vm657_vm1, %v4517_v23, %v951_v30  ;;  %v754_v34 = vadd.f32 %v738_v25, %v721_v2  ;;  %v4518_v12 = vrot.slane %v3744_v39, 1 }
 0x133   : > { %v1226_v7 = vrot.slane %v1171_v61, 2  ;;  %v465_v50 = vmul.f32 %v2545_v47, %v2944_v8  ;;  %v1522_v32 = vsel %vm4030_vm3, %v2455_v43, %v1518_v19  ;;  %vm1579_vm4 = vweird.f32 %v1362_v27 }
 0x134   : > { %v1106_v36 = vsel %vm535_vm0, %v4518_v12, %v1105_v46  ;;  %v4051_v26 = vadd.f32 %v3818_v41, %v1267_v58  ;;  %v875_v25 = vadd.f32 %v831_v38, %v754_v34  ;;  %v1527_v29 = vsel %vm4000_vm15, %v1526_v35, %v1522_v32 }
 0x135   : > { %v1583_v48 = vand.u32 2147483647, %v1362_v27  ;;  %v1585_v30 = vand.u32 2147483648, %v1362_v27  ;;  %v564_v39 = vrot.slane %v504_v22, 1  ;;  %v1614_v63 = vmul.f32 %v1527_v29, %v3901_v40 }
 0x136   : > { %v2250_v62 = vmul.f32 -1.442695, %v4051_v26  ;;  %v996_v16 = vadd.f32 %v952_v45, %v875_v25  ;;  %v686_v57 = vrot.slane %v626_v53, 2  ;;  %v4519_v54 = vrot.slane %v3767_v1, 1 }
 0x137   : > { %v742_v47 = vmul.f32 %v2546_v6, %v2950_v11  ;;  %v781_v55 = vmul.f32 %v2955_v13, %v3484_v28  ;;  %v902_v35 = vmul.f32 %v2957_v14, %v3484_v28  ;;  %1686 = vmatmul.f32.gmra.mxu2 %v1614_v63  ;;  %v4520_v56 = vrot.slane %v3782_v37, 2  ;;  %v2459_v5 = vpop.eup %2458 }
 0x138   : > { %v565_v43 = vsel %vm535_vm0, %v4519_v54, %v564_v39  ;;  %2460 = vpow2.f32 %v2250_v62  ;;  %v1029_v40 = vadd.f32 %v1013_v51, %v996_v16  ;;  %v4521_v33 = vrot.slane %v3756_v59, 2  ;;  %v2547_v59 = vld [vmem:[%s2833_s8 + $0xb0] sm:$0xff] }
 0x139   : > { %v603_v61 = vadd.f32 %v565_v43, %v465_v50  ;;  %v687_v1 = vsel %vm657_vm1, %v4520_v56, %v686_v57  ;;  %v840_v46 = vrot.slane %v781_v55, 1  ;;  %v961_v21 = vrot.slane %v902_v35, 2 }
 0x13a   : > { %v1227_v2 = vsel %vm657_vm1, %v4521_v33, %v1226_v7  ;;  %v1056_v60 = vmul.f32 %v2970_v20, %v3530_v44  ;;  %v1575_v28 = vmul.f32 %v2459_v5, %v1362_v27  ;;  %vm4074_vm5 = vcmp.eq.f32.partialorder %v1583_v48, 8.507059e+37 }
 0x13b   : > { %v1150_v51 = vadd.f32 %v1106_v36, %v1029_v40  ;;  %v725_v23 = vadd.f32 %v687_v1, %v603_v61  ;;  %v1586_v37 = vor.u32 1.1754944e-38, %v1585_v30  ;;  %v4524_v45 = vrot.slane %v3803_v31, 1  ;;  %v4530_v61 = vld [vmem:[#allocation18_spill] sm:$0xff]  ;;  %v2548_v1 = vld [vmem:[%s2833_s8 + $0xc8] sm:$0xff] }
 0x13c   : > { %v1017_v19 = vmul.f32 %v2547_v59, %v2959_v15  ;;  %v1177_v58 = vmul.f32 %v2979_v24, %v3530_v44  ;;  %v1576_v34 = vsub.f32 1.0, %v1575_v28  ;;  %vm1580_vm6 = vweird.f32 %v2459_v5 }
 0x13d   : > { %v841_v22 = vsel %vm535_vm0, %v4524_v45, %v840_v46  ;;  %v1271_v53 = vadd.f32 %v1227_v2, %v1150_v51  ;;  %v758_v12 = vadd.f32 %v742_v47, %v725_v23  ;;  %v4525_v7 = vrot.slane %v3809_v52, 2  ;;  %vm4097_vm7 = vmor %vm1579_vm4, %vm1580_vm6  ;;  %v449_v47 = vld [vmem:[%s2833_s8 + $0xe8] sm:$0x3] }
 0x13e   : > { %v1115_v50 = vrot.slane %v1056_v60, 1  ;;  %v510_v31 = vmul.f32 %v2946_v9, %v3530_v44  ;;  %v632_v32 = vmul.f32 %v2948_v10, %v3530_v44  ;;  %v2461_v25 = vpop.eup %2460  ;;  %v1577_v29 = vmul.f32 %v2459_v5, %v1576_v34  ;;  %v4534_v34 = vld [vmem:[#allocation22_spill] sm:$0xff] }
 0x13f   : > { %v962_v36 = vsel %vm657_vm1, %v4525_v7, %v961_v21  ;;  %v4093_v48 = vadd.f32 %v3818_v41, %v1271_v53  ;;  %v879_v30 = vadd.f32 %v841_v22, %v758_v12  ;;  %v469_v39 = vmul.f32 %v2547_v59, %v2944_v8 }
 0x140   : > { %v1351_v63 = vadd.f32 1.0, %v2461_v25  ;;  %v1236_v62 = vrot.slane %v1177_v58, 2  ;;  %v574_v9 = vrot.slane %v510_v31, 1  ;;  %v696_v16 = vrot.slane %v632_v32, 2 }
 0x141   : > { %v1578_v10 = vadd.f32 %v2459_v5, %v1577_v29  ;;  %v2254_v44 = vmul.f32 -1.442695, %v4093_v48  ;;  %v1000_v57 = vadd.f32 %v962_v36, %v879_v30  ;;  %v787_v54 = vmul.f32 %v2955_v13, %v3536_v49 }
 0x142   : > { %2462 = vrcp.f32 %v1351_v63  ;;  %v4528_v8 = vrot.slane %v3832_v42, 1  ;;  %v4529_v55 = vrot.slane %v3856_v18, 1  ;;  %v4531_v13 = vrot.slane %v4530_v61, 2  ;;  %v1657_v61 = vpop.f32.mrf.mxu0 }
 0x143   : > { %v1582_v43 = vsel %vm4097_vm7, %v2459_v5, %v1578_v10  ;;  %2464 = vpow2.f32 %v2254_v44  ;;  %v1033_v6 = vadd.f32 %v1017_v19, %v1000_v57  ;;  %v746_v33 = vmul.f32 %v2548_v1, %v2950_v11  ;;  %v1669_v1 = vpop.f32.mrf.mxu1 }
 0x144   : > { %v1116_v27 = vsel %vm535_vm0, %v4528_v8, %v1115_v50  ;;  %v575_v35 = vsel %vm535_vm0, %v4529_v55, %v574_v9  ;;  %v1587_v40 = vsel %vm4074_vm5, %v1586_v37, %v1582_v43  ;;  %v1237_v56 = vsel %vm657_vm1, %v4531_v13, %v1236_v62  ;;  %v4536_v50 = vld [vmem:[#allocation20_spill] sm:$0xff]  ;;  %v4538_v9 = vld [vmem:[#allocation21_spill] sm:$0xff] }
 0x145   : > { %v607_v42 = vadd.f32 %v575_v35, %v469_v39  ;;  %v1618_v5 = vmul.f32 %v1587_v40, %v3979_v0  ;;  %v1154_v2 = vadd.f32 %v1116_v27, %v1033_v6  ;;  %v4532_v46 = vrot.slane %v3869_v17, 2  ;;  %v4154_v40 = vld [vmem:[%s4326_s4] ss:$0 sm:$0xff] }
 0x146   : > { %v850_v21 = vrot.slane %v787_v54, 1  ;;  %v908_v28 = vmul.f32 %v2957_v14, %v3536_v49  ;;  %v1062_v38 = vmul.f32 %v2970_v20, %v449_v47  ;;  %v4533_v23 = vrot.slane %v3887_v4, 1 }
 0x147   : > { %v697_v18 = vsel %vm657_vm1, %v4532_v46, %v696_v16  ;;  %1698 = vmatmul.f32.gmra.mxu3 %v1618_v5  ;;  %v1275_v51 = vadd.f32 %v1237_v56, %v1154_v2  ;;  %vm1414_vm8 = vweird.f32 %v1351_v63  ;;  %v1183_v17 = vmul.f32 %v2979_v24, %v449_v47 }
 0x148   : > { %v729_v60 = vadd.f32 %v697_v18, %v607_v42  ;;  %v851_v11 = vsel %vm535_vm0, %v4533_v23, %v850_v21  ;;  %v2463_v37 = vpop.eup %2462  ;;  %v971_v45 = vrot.slane %v908_v28, 2  ;;  %v1418_v19 = vand.u32 2147483647, %v1351_v63 }
 0x149   : > { %v2465_v22 = vpop.eup %2464  ;;  %v1410_v59 = vmul.f32 %v2463_v37, %v1351_v63  ;;  %v1420_v58 = vand.u32 2147483648, %v1351_v63  ;;  %v4132_v14 = vadd.f32 %v3818_v41, %v1275_v51  ;;  %v4535_v53 = vrot.slane %v4534_v34, 2 }
 0x14a   : > { %v762_v0 = vadd.f32 %v746_v33, %v729_v60  ;;  %v1355_v20 = vadd.f32 1.0, %v2465_v22  ;;  %v1125_v12 = vrot.slane %v1062_v38, 1  ;;  %vm1415_vm9 = vweird.f32 %v2463_v37  ;;  %v1681_v2 = vpop.f32.mrf.mxu2 }
 0x14b   : > { %v972_v4 = vsel %vm657_vm1, %v4535_v53, %v971_v45  ;;  %v1411_v7 = vsub.f32 1.0, %v1410_v59  ;;  %v2258_v36 = vmul.f32 -1.442695, %v4132_v14  ;;  %v1021_v24 = vmul.f32 %v2959_v15, %v4536_v50  ;;  %vm1416_vm10 = vmor %vm1414_vm8, %vm1415_vm9 }
 0x14c   : > { %v883_v49 = vadd.f32 %v851_v11, %v762_v0  ;;  %2466 = vrcp.f32 %v1355_v20  ;;  %v1246_v31 = vrot.slane %v1183_v17, 2  ;;  %v1421_v29 = vor.u32 1.1754944e-38, %v1420_v58 }
 0x14d   : > { %v1412_v32 = vmul.f32 %v2463_v37, %v1411_v7  ;;  %2468 = vpow2.f32 %v2258_v36  ;;  %v4537_v30 = vrot.slane %v3922_v3, 1  ;;  %vm1419_vm11 = vcmp.eq.f32.partialorder %v1418_v19, 8.507059e+37 }
 0x14e   : > { %v1004_v25 = vadd.f32 %v972_v4, %v883_v49  ;;  %v4539_v16 = vrot.slane %v4538_v9, 2  ;;  %v1478_v6 = vand.u32 2147483647, %v1355_v20  ;;  %v1480_v3 = vand.u32 2147483648, %v1355_v20 }
 0x14f   : > { %v1126_v39 = vsel %vm535_vm0, %v4537_v30, %v1125_v12  ;;  %v1413_v52 = vadd.f32 %v2463_v37, %v1412_v32  ;;  %vm1474_vm0 = vweird.f32 %v1355_v20  ;;  %v4158_v56 = vadd.f32 %v4154_v40, %v1657_v61 }
 0x150   : > { %v1037_v62 = vadd.f32 %v1021_v24, %v1004_v25  ;;  %v1247_v10 = vsel %vm657_vm1, %v4539_v16, %v1246_v31  ;;  %vm1479_vm13 = vcmp.eq.f32.partialorder %v1478_v6, 8.507059e+37  ;;  %v1481_v42 = vor.u32 1.1754944e-38, %v1480_v3 }
 0x151   : > { %v1417_v15 = vsel %vm1416_vm10, %v2463_v37, %v1413_v52  ;;  %v4162_v5 = vadd.f32 %v4154_v40, %v1669_v1  ;;  %v4165_v46 = vadd.f32 %v4154_v40, %v1681_v2 }
 0x152   : > { %v1158_v44 = vadd.f32 %v1126_v39, %v1037_v62  ;;  %v2467_v57 = vpop.eup %2466  ;;  %v1422_v54 = vsel %vm1419_vm11, %v1421_v29, %v1417_v15 }
 0x153   : > { %v2469_v8 = vpop.eup %2468  ;;  %v1607_v63 = vmul.f32 %v1422_v54, %v4051_v26  ;;  %v1470_v27 = vmul.f32 %v2467_v57, %v1355_v20  ;;  %vm1475_vm12 = vweird.f32 %v2467_v57  ;;  %v2267_v21 = vmul.f32 -1.442695, %v4162_v5 }
 0x154   : > { %v1279_v43 = vadd.f32 %v1247_v10, %v1158_v44  ;;  %v1359_v47 = vadd.f32 1.0, %v2469_v8  ;;  %vm1476_vm1 = vmor %vm1474_vm0, %vm1475_vm12  ;;  %v2271_v38 = vmul.f32 -1.442695, %v4165_v46 }
 0x155   : > { %1665 = vmatmul.f32.gmra.mxu0 %v1607_v63  ;;  %v1471_v55 = vsub.f32 1.0, %v1470_v27 }
 0x156   : > { %v4149_v35 = vadd.f32 %v3818_v41, %v1279_v43  ;;  %2470 = vrcp.f32 %v1359_v47  ;;  %v2263_v41 = vmul.f32 -1.442695, %v4158_v56  ;;  %vm1534_vm14 = vweird.f32 %v1359_v47 }
 0x157   : > { %v1472_v26 = vmul.f32 %v2467_v57, %v1471_v55  ;;  %v1538_v11 = vand.u32 2147483647, %v1359_v47  ;;  %v1540_v37 = vand.u32 2147483648, %v1359_v47 }
 0x158   : > { %v2262_v13 = vmul.f32 -1.442695, %v4149_v35  ;;  %v1693_v0 = vpop.f32.mrf.mxu3 }
 0x159   : > { %v1473_v33 = vadd.f32 %v2467_v57, %v1472_v26  ;;  %v4171_v22 = vadd.f32 %v4154_v40, %v1693_v0  ;;  %vm1539_vm3 = vcmp.eq.f32.partialorder %v1538_v11, 8.507059e+37 }
 0x15a   : > { %2472 = vpow2.f32 %v2262_v13 }
 0x15b   : > { %v1477_v18 = vsel %vm1476_vm1, %v2467_v57, %v1473_v33  ;;  %2474 = vpow2.f32 %v2263_v41  ;;  %v2275_v20 = vmul.f32 -1.442695, %v4171_v22 }
 0x15c   : > { %v2471_v60 = vpop.eup %2470  ;;  %v1482_v28 = vsel %vm1479_vm13, %v1481_v42, %v1477_v18  ;;  %2476 = vpow2.f32 %v2267_v21 }
 0x15d   : > { %v1611_v51 = vmul.f32 %v1482_v28, %v4093_v48  ;;  %v1530_v23 = vmul.f32 %v2471_v60, %v1359_v47  ;;  %vm1535_vm15 = vweird.f32 %v2471_v60  ;;  %2478 = vpow2.f32 %v2271_v38 }
 0x15e   : > { %vm1536_vm2 = vmor %vm1534_vm14, %vm1535_vm15  ;;  %v1541_v48 = vor.u32 1.1754944e-38, %v1540_v37 }
 0x15f   : > { %1677 = vmatmul.f32.gmra.mxu1 %v1611_v51  ;;  %v1531_v17 = vsub.f32 1.0, %v1530_v23 }
 0x160   : > { %v2473_v45 = vpop.eup %2472 }
 0x161   : > { %v1363_v59 = vadd.f32 1.0, %v2473_v45  ;;  %v2475_v19 = vpop.eup %2474  ;;  %v1532_v58 = vmul.f32 %v2471_v60, %v1531_v17 }
 0x162   : > { %v2477_v49 = vpop.eup %2476  ;;  %v1753_v53 = vadd.f32 1.0, %v2475_v19  ;;  %v1660_v50 = vpop.f32.mrf.mxu0 }
 0x163   : > { %2480 = vrcp.f32 %v1363_v59  ;;  %v1533_v34 = vadd.f32 %v2471_v60, %v1532_v58  ;;  %v4174_v4 = vadd.f32 1.0, %v2477_v49  ;;  %v2479_v12 = vpop.eup %2478  ;;  %v1598_v32 = vand.u32 2147483647, %v1363_v59 }
 0x164   : > { %2482 = vpow2.f32 %v2275_v20  ;;  %v1600_v25 = vand.u32 2147483648, %v1363_v59  ;;  %v4178_v29 = vadd.f32 1.0, %v2479_v12  ;;  %v4181_v30 = vadd.f32 %v4154_v40, %v1660_v50 }
 0x165   : > { %v1537_v7 = vsel %vm1536_vm2, %v2471_v60, %v1533_v34  ;;  %2484 = vrcp.f32 %v1753_v53  ;;  %vm1594_vm4 = vweird.f32 %v1363_v59  ;;  %v1778_v62 = vand.u32 2147483647, %v1753_v53 }
 0x166   : > { %v1542_v36 = vsel %vm1539_vm3, %v1541_v48, %v1537_v7  ;;  %2486 = vrcp.f32 %v4174_v4  ;;  %v1780_v9 = vand.u32 2147483648, %v1753_v53  ;;  %v1838_v16 = vand.u32 2147483647, %v4174_v4 }
 0x167   : > { %v1615_v24 = vmul.f32 %v1542_v36, %v4132_v14  ;;  %2488 = vrcp.f32 %v4178_v29  ;;  %v2264_v44 = vmul.f32 -1.442695, %v4181_v30  ;;  %vm4188_vm6 = vcmp.eq.f32.partialorder %v1598_v32, 8.507059e+37 }
 0x168   : > { %v1601_v8 = vor.u32 1.1754944e-38, %v1600_v25  ;;  %v1840_v27 = vand.u32 2147483648, %v4174_v4  ;;  %vm1774_vm7 = vweird.f32 %v1753_v53  ;;  %vm4200_vm9 = vcmp.eq.f32.partialorder %v1778_v62, 8.507059e+37 }
 0x169   : > { %v2481_v31 = vpop.eup %2480  ;;  %1689 = vmatmul.f32.gmra.mxu2 %v1615_v24  ;;  %v1781_v61 = vor.u32 1.1754944e-38, %v1780_v9  ;;  %vm1834_vm10 = vweird.f32 %v4174_v4  ;;  %vm4205_vm11 = vcmp.eq.f32.partialorder %v1838_v16, 8.507059e+37  ;;  %v1900_v2 = vand.u32 2147483648, %v4178_v29 }
 0x16a   : > { %v2483_v39 = vpop.eup %2482  ;;  %v1590_v52 = vmul.f32 %v2481_v31, %v1363_v59  ;;  %vm1595_vm5 = vweird.f32 %v2481_v31  ;;  %v1841_v41 = vor.u32 1.1754944e-38, %v1840_v27  ;;  %vm1894_vm1 = vweird.f32 %v4178_v29 }
 0x16b   : > { %v2485_v10 = vpop.eup %2484  ;;  %v4185_v15 = vadd.f32 1.0, %v2483_v39  ;;  %vm4196_vm8 = vmor %vm1594_vm4, %vm1595_vm5  ;;  %v1898_v51 = vand.u32 2147483647, %v4178_v29  ;;  %v1901_v19 = vor.u32 1.1754944e-38, %v1900_v2 }
 0x16c   : > { %v1591_v14 = vsub.f32 1.0, %v1590_v52  ;;  %v2487_v57 = vpop.eup %2486  ;;  %v1770_v63 = vmul.f32 %v2485_v10, %v1753_v53  ;;  %vm1775_vm0 = vweird.f32 %v2485_v10 }
 0x16d   : > { %v1830_v6 = vmul.f32 %v2487_v57, %v4174_v4  ;;  %2490 = vrcp.f32 %v4185_v15  ;;  %v2489_v1 = vpop.eup %2488  ;;  %vm1835_vm12 = vweird.f32 %v2487_v57  ;;  %vm1776_vm13 = vmor %vm1774_vm7, %vm1775_vm0  ;;  %v1960_v24 = vand.u32 2147483648, %v4185_v15 }
 0x16e   : > { %v1592_v43 = vmul.f32 %v2481_v31, %v1591_v14  ;;  %v1771_v47 = vsub.f32 1.0, %v1770_v63  ;;  %2492 = vpow2.f32 %v2264_v44  ;;  %v1890_v60 = vmul.f32 %v2489_v1, %v4178_v29  ;;  %v1672_v23 = vpop.f32.mrf.mxu1  ;;  %vm1836_vm14 = vmor %vm1834_vm10, %vm1835_vm12 }
 0x16f   : > { %v1831_v13 = vsub.f32 1.0, %v1830_v6  ;;  %v4220_v17 = vadd.f32 %v4154_v40, %v1672_v23  ;;  %vm1895_vm15 = vweird.f32 %v2489_v1  ;;  %vm1899_vm4 = vcmp.eq.f32.partialorder %v1898_v51, 8.507059e+37 }
 0x170   : > { %v1593_v26 = vadd.f32 %v2481_v31, %v1592_v43  ;;  %v1772_v33 = vmul.f32 %v2485_v10, %v1771_v47  ;;  %v1891_v45 = vsub.f32 1.0, %v1890_v60  ;;  %vm1896_vm2 = vmor %vm1894_vm1, %vm1895_vm15  ;;  %vm1954_vm5 = vweird.f32 %v4185_v15 }
 0x171   : > { %v1832_v21 = vmul.f32 %v2487_v57, %v1831_v13  ;;  %v2268_v34 = vmul.f32 -1.442695, %v4220_v17  ;;  %v1961_v52 = vor.u32 1.1754944e-38, %v1960_v24 }
 0x172   : > { %v1597_v18 = vsel %vm4196_vm8, %v2481_v31, %v1593_v26  ;;  %v1773_v38 = vadd.f32 %v2485_v10, %v1772_v33  ;;  %v1892_v49 = vmul.f32 %v2489_v1, %v1891_v45 }
 0x173   : > { %v1602_v28 = vsel %vm4188_vm6, %v1601_v8, %v1597_v18  ;;  %v2491_v11 = vpop.eup %2490  ;;  %v1833_v0 = vadd.f32 %v2487_v57, %v1832_v21  ;;  %2494 = vpow2.f32 %v2268_v34 }
 0x174   : > { %v1619_v37 = vmul.f32 %v1602_v28, %v4149_v35  ;;  %v1777_v59 = vsel %vm1776_vm13, %v2485_v10, %v1773_v38  ;;  %v1950_v58 = vmul.f32 %v2491_v11, %v4185_v15  ;;  %v2493_v20 = vpop.eup %2492  ;;  %v1893_v50 = vadd.f32 %v2489_v1, %v1892_v49 }
 0x175   : > { %v1782_v35 = vsel %vm4200_vm9, %v1781_v61, %v1777_v59  ;;  %v1837_v48 = vsel %vm1836_vm14, %v2487_v57, %v1833_v0  ;;  %v1754_v7 = vadd.f32 1.0, %v2493_v20  ;;  %vm1955_vm3 = vweird.f32 %v2491_v11 }
 0x176   : > { %1701 = vmatmul.f32.gmra.mxu3 %v1619_v37  ;;  %v2009_v53 = vmul.f32 %v1782_v35, %v4158_v56  ;;  %v1842_v4 = vsel %vm4205_vm11, %v1841_v41, %v1837_v48  ;;  %v1951_v12 = vsub.f32 1.0, %v1950_v58  ;;  %v1958_v56 = vand.u32 2147483647, %v4185_v15  ;;  %vm1956_vm6 = vmor %vm1954_vm5, %vm1955_vm3 }
 0x177   : > { %v2013_v36 = vmul.f32 %v1842_v4, %v4162_v5  ;;  %2496 = vrcp.f32 %v1754_v7  ;;  %v1897_v32 = vsel %vm1896_vm2, %v2489_v1, %v1893_v50  ;;  %v1795_v54 = vand.u32 2147483648, %v1754_v7 }
 0x178   : > { %2025 = vst [vmem:[%s2758_s27] sm:$0xff] %v2009_v53  ;;  %v1952_v31 = vmul.f32 %v2491_v11, %v1951_v12  ;;  %v1902_v5 = vsel %vm1899_vm4, %v1901_v19, %v1897_v32  ;;  %vm1959_vm7 = vcmp.eq.f32.partialorder %v1958_v56, 8.507059e+37  ;;  %vm1789_vm8 = vweird.f32 %v1754_v7 }
 0x179   : > { %2029 = vst [vmem:[%s2758_s27 + $0x20] sm:$0xff] %v2013_v36  ;;  %v2017_v39 = vmul.f32 %v1902_v5, %v4165_v46  ;;  %v2495_v62 = vpop.eup %2494  ;;  %v1793_v46 = vand.u32 2147483647, %v1754_v7  ;;  %v1796_v6 = vor.u32 1.1754944e-38, %v1795_v54 }
 0x17a   : > { %v1953_v25 = vadd.f32 %v2491_v11, %v1952_v31  ;;  %v1758_v14 = vadd.f32 1.0, %v2495_v62 }
 0x17b   : > { %2033 = vst [vmem:[%s2758_s27 + $0x40] sm:$0xff] %v2017_v39  ;;  %vm1794_vm11 = vcmp.eq.f32.partialorder %v1793_v46, 8.507059e+37 }
 0x17c   : > { %v1957_v29 = vsel %vm1956_vm6, %v2491_v11, %v1953_v25  ;;  %2498 = vrcp.f32 %v1758_v14  ;;  %v1855_v13 = vand.u32 2147483648, %v1758_v14  ;;  %vm1849_vm0 = vweird.f32 %v1758_v14 }
 0x17d   : > { %v1962_v9 = vsel %vm1959_vm7, %v1961_v52, %v1957_v29  ;;  %v2497_v16 = vpop.eup %2496  ;;  %v1853_v1 = vand.u32 2147483647, %v1758_v14 }
 0x17e   : > { %v2021_v10 = vmul.f32 %v1962_v9, %v4171_v22  ;;  %v1785_v44 = vmul.f32 %v2497_v16, %v1754_v7  ;;  %vm1790_vm9 = vweird.f32 %v2497_v16  ;;  %v1856_v41 = vor.u32 1.1754944e-38, %v1855_v13 }
 0x17f   : > { %vm1791_vm10 = vmor %vm1789_vm8, %vm1790_vm9  ;;  %vm1854_vm13 = vcmp.eq.f32.partialorder %v1853_v1, 8.507059e+37 }
 0x180   : > { %2037 = vst [vmem:[%s2758_s27 + $0x60] sm:$0xff] %v2021_v10  ;;  %v1786_v57 = vsub.f32 1.0, %v1785_v44  ;;  %v1684_v15 = vpop.f32.mrf.mxu2 }
 0x181   : > { %v1685_v27 = vadd.f32 %v4154_v40, %v1684_v15 }
 0x182   : > { %v1787_v8 = vmul.f32 %v2497_v16, %v1786_v57  ;;  %v2499_v43 = vpop.eup %2498 }
 0x183   : > { %v1845_v22 = vmul.f32 %v2499_v43, %v1758_v14  ;;  %v2272_v47 = vmul.f32 -1.442695, %v1685_v27  ;;  %vm1850_vm12 = vweird.f32 %v2499_v43 }
 0x184   : > { %v1788_v63 = vadd.f32 %v2497_v16, %v1787_v8  ;;  %vm1851_vm1 = vmor %vm1849_vm0, %vm1850_vm12 }
 0x185   : > { %v1846_v26 = vsub.f32 1.0, %v1845_v22  ;;  %2500 = vpow2.f32 %v2272_v47 }
 0x186   : > { %v1792_v3 = vsel %vm1791_vm10, %v2497_v16, %v1788_v63 }
 0x187   : > { %v1797_v55 = vsel %vm1794_vm11, %v1796_v6, %v1792_v3  ;;  %v1847_v42 = vmul.f32 %v2499_v43, %v1846_v26 }
 0x188   : > { %v2010_v61 = vmul.f32 %v1797_v55, %v4181_v30 }
 0x189   : > { %v1848_v33 = vadd.f32 %v2499_v43, %v1847_v42 }
 0x18a   : > { %2026 = vst [vmem:[%s2758_s27 + $0x8] sm:$0xff] %v2010_v61  ;;  %v1696_v2 = vpop.f32.mrf.mxu3 }
 0x18b   : > { %v2501_v18 = vpop.eup %2500  ;;  %v1852_v21 = vsel %vm1851_vm1, %v2499_v43, %v1848_v33  ;;  %v1697_v60 = vadd.f32 %v4154_v40, %v1696_v2 }
 0x18c   : > { %v1857_v28 = vsel %vm1854_vm13, %v1856_v41, %v1852_v21  ;;  %v1762_v30 = vadd.f32 1.0, %v2501_v18 }
 0x18d   : > { %v2014_v38 = vmul.f32 %v1857_v28, %v4220_v17  ;;  %v2276_v51 = vmul.f32 -1.442695, %v1697_v60 }
 0x18e   : > { %2502 = vrcp.f32 %v1762_v30  ;;  %v1915_v20 = vand.u32 2147483648, %v1762_v30  ;;  %v1913_v17 = vand.u32 2147483647, %v1762_v30  ;;  %vm1909_vm15 = vweird.f32 %v1762_v30 }
 0x18f   : > { %2030 = vst [vmem:[%s2758_s27 + $0x28] sm:$0xff] %v2014_v38  ;;  %2504 = vpow2.f32 %v2276_v51 }
 0x190   : > { %v1916_v49 = vor.u32 1.1754944e-38, %v1915_v20  ;;  %vm1914_vm3 = vcmp.eq.f32.partialorder %v1913_v17, 8.507059e+37 }
 0x192   : > { %v1663_v23 = vpop.f32.mrf.mxu0 }
 0x193   : > { %v1664_v11 = vadd.f32 %v4154_v40, %v1663_v23 }
 0x194   : > { %v2503_v37 = vpop.eup %2502 }
 0x195   : > { %v2505_v0 = vpop.eup %2504  ;;  %v1905_v45 = vmul.f32 %v2503_v37, %v1762_v30  ;;  %v2265_v59 = vmul.f32 -1.442695, %v1664_v11  ;;  %vm1910_vm14 = vweird.f32 %v2503_v37 }
 0x196   : > { %v1766_v19 = vadd.f32 1.0, %v2505_v0  ;;  %vm1911_vm2 = vmor %vm1909_vm15, %vm1910_vm14 }
 0x197   : > { %v1906_v58 = vsub.f32 1.0, %v1905_v45  ;;  %2506 = vpow2.f32 %v2265_v59 }
 0x198   : > { %2508 = vrcp.f32 %v1766_v19  ;;  %v1975_v31 = vand.u32 2147483648, %v1766_v19  ;;  %v1973_v32 = vand.u32 2147483647, %v1766_v19  ;;  %vm1969_vm5 = vweird.f32 %v1766_v19 }
 0x199   : > { %v1907_v35 = vmul.f32 %v2503_v37, %v1906_v58 }
 0x19a   : > { %v1976_v29 = vor.u32 1.1754944e-38, %v1975_v31  ;;  %vm1974_vm7 = vcmp.eq.f32.partialorder %v1973_v32, 8.507059e+37 }
 0x19b   : > { %v1908_v48 = vadd.f32 %v2503_v37, %v1907_v35 }
 0x19d   : > { %v2507_v34 = vpop.eup %2506  ;;  %v1912_v53 = vsel %vm1911_vm2, %v2503_v37, %v1908_v48 }
 0x19e   : > { %v2509_v4 = vpop.eup %2508  ;;  %v1917_v12 = vsel %vm1914_vm3, %v1916_v49, %v1912_v53  ;;  %v1755_v7 = vadd.f32 1.0, %v2507_v34 }
 0x19f   : > { %v2018_v36 = vmul.f32 %v1917_v12, %v1685_v27  ;;  %v1965_v50 = vmul.f32 %v2509_v4, %v1766_v19  ;;  %vm1970_vm4 = vweird.f32 %v2509_v4 }
 0x1a0   : > { %2510 = vrcp.f32 %v1755_v7  ;;  %vm1971_vm6 = vmor %vm1969_vm5, %vm1970_vm4  ;;  %v1810_v57 = vand.u32 2147483648, %v1755_v7  ;;  %vm1804_vm8 = vweird.f32 %v1755_v7  ;;  %v1808_v8 = vand.u32 2147483647, %v1755_v7 }
 0x1a1   : > { %2034 = vst [vmem:[%s2758_s27 + $0x48] sm:$0xff] %v2018_v36  ;;  %v1966_v24 = vsub.f32 1.0, %v1965_v50 }
 0x1a2   : > { %v1811_v15 = vor.u32 1.1754944e-38, %v1810_v57  ;;  %vm1809_vm11 = vcmp.eq.f32.partialorder %v1808_v8, 8.507059e+37 }
 0x1a3   : > { %v1967_v56 = vmul.f32 %v2509_v4, %v1966_v24 }
 0x1a5   : > { %v1675_v5 = vpop.f32.mrf.mxu1  ;;  %v1968_v25 = vadd.f32 %v2509_v4, %v1967_v56 }
 0x1a6   : > { %v1676_v39 = vadd.f32 %v4154_v40, %v1675_v5  ;;  %v2511_v52 = vpop.eup %2510 }
 0x1a7   : > { %v1972_v62 = vsel %vm1971_vm6, %v2509_v4, %v1968_v25  ;;  %v1800_v9 = vmul.f32 %v2511_v52, %v1755_v7  ;;  %vm1805_vm9 = vweird.f32 %v2511_v52 }
 0x1a8   : > { %v2269_v16 = vmul.f32 -1.442695, %v1676_v39  ;;  %v1977_v10 = vsel %vm1974_vm7, %v1976_v29, %v1972_v62  ;;  %vm1806_vm10 = vmor %vm1804_vm8, %vm1805_vm9 }
 0x1a9   : > { %v2022_v14 = vmul.f32 %v1977_v10, %v1697_v60  ;;  %v1801_v44 = vsub.f32 1.0, %v1800_v9 }
 0x1aa   : > { %2512 = vpow2.f32 %v2269_v16 }
 0x1ab   : > { %2038 = vst [vmem:[%s2758_s27 + $0x68] sm:$0xff] %v2022_v14  ;;  %v1802_v54 = vmul.f32 %v2511_v52, %v1801_v44 }
 0x1ad   : > { %v1803_v46 = vadd.f32 %v2511_v52, %v1802_v54 }
 0x1af   : > { %v1807_v27 = vsel %vm1806_vm10, %v2511_v52, %v1803_v46 }
 0x1b0   : > { %v2513_v63 = vpop.eup %2512  ;;  %v1812_v43 = vsel %vm1809_vm11, %v1811_v15, %v1807_v27 }
 0x1b1   : > { %v1759_v6 = vadd.f32 1.0, %v2513_v63  ;;  %v2011_v3 = vmul.f32 %v1812_v43, %v1664_v11 }
 0x1b3   : > { %2514 = vrcp.f32 %v1759_v6  ;;  %2027 = vst [vmem:[%s2758_s27 + $0x10] sm:$0xff] %v2011_v3  ;;  %vm1864_vm0 = vweird.f32 %v1759_v6  ;;  %v1870_v42 = vand.u32 2147483648, %v1759_v6  ;;  %v1868_v33 = vand.u32 2147483647, %v1759_v6 }
 0x1b5   : > { %v1871_v2 = vor.u32 1.1754944e-38, %v1870_v42  ;;  %vm1869_vm13 = vcmp.eq.f32.partialorder %v1868_v33, 8.507059e+37 }
 0x1b9   : > { %v2515_v22 = vpop.eup %2514 }
 0x1ba   : > { %v1687_v47 = vpop.f32.mrf.mxu2  ;;  %v1860_v55 = vmul.f32 %v2515_v22, %v1759_v6  ;;  %vm1865_vm12 = vweird.f32 %v2515_v22 }
 0x1bb   : > { %v1688_v61 = vadd.f32 %v4154_v40, %v1687_v47  ;;  %vm1866_vm1 = vmor %vm1864_vm0, %vm1865_vm12 }
 0x1bc   : > { %v1861_v26 = vsub.f32 1.0, %v1860_v55 }
 0x1bd   : > { %v2273_v13 = vmul.f32 -1.442695, %v1688_v61 }
 0x1be   : > { %v1862_v1 = vmul.f32 %v2515_v22, %v1861_v26 }
 0x1bf   : > { %2516 = vpow2.f32 %v2273_v13 }
 0x1c0   : > { %v1863_v41 = vadd.f32 %v2515_v22, %v1862_v1 }
 0x1c2   : > { %v1867_v18 = vsel %vm1866_vm1, %v2515_v22, %v1863_v41 }
 0x1c3   : > { %v1872_v21 = vsel %vm1869_vm13, %v1871_v2, %v1867_v18 }
 0x1c4   : > { %v2015_v28 = vmul.f32 %v1872_v21, %v1676_v39 }
 0x1c5   : > { %v2517_v60 = vpop.eup %2516 }
 0x1c6   : > { %v1763_v30 = vadd.f32 1.0, %v2517_v60  ;;  %2031 = vst [vmem:[%s2758_s27 + $0x30] sm:$0xff] %v2015_v28 }
 0x1c8   : > { %2518 = vrcp.f32 %v1763_v30  ;;  %v1930_v19 = vand.u32 2147483648, %v1763_v30  ;;  %v1928_v35 = vand.u32 2147483647, %v1763_v30  ;;  %vm1924_vm15 = vweird.f32 %v1763_v30 }
 0x1ca   : > { %v1699_v38 = vpop.f32.mrf.mxu3  ;;  %v1931_v34 = vor.u32 1.1754944e-38, %v1930_v19  ;;  %vm1929_vm3 = vcmp.eq.f32.partialorder %v1928_v35, 8.507059e+37 }
 0x1cb   : > { %v1700_v51 = vadd.f32 %v4154_v40, %v1699_v38 }
 0x1cd   : > { %v2277_v23 = vmul.f32 -1.442695, %v1700_v51 }
 0x1ce   : > { %v2519_v11 = vpop.eup %2518 }
 0x1cf   : > { %2520 = vpow2.f32 %v2277_v23  ;;  %v1920_v37 = vmul.f32 %v2519_v11, %v1763_v30  ;;  %vm1925_vm14 = vweird.f32 %v2519_v11 }
 0x1d0   : > { %vm1926_vm2 = vmor %vm1924_vm15, %vm1925_vm14 }
 0x1d1   : > { %v1921_v45 = vsub.f32 1.0, %v1920_v37 }
 0x1d2   : > { %v1666_v0 = vpop.f32.mrf.mxu0 }
 0x1d3   : > { %v4259_v59 = vadd.f32 %v4154_v40, %v1666_v0  ;;  %v1922_v20 = vmul.f32 %v2519_v11, %v1921_v45 }
 0x1d5   : > { %v2521_v58 = vpop.eup %2520  ;;  %v2266_v17 = vmul.f32 -1.442695, %v4259_v59  ;;  %v1923_v49 = vadd.f32 %v2519_v11, %v1922_v20 }
 0x1d6   : > { %v1767_v48 = vadd.f32 1.0, %v2521_v58 }
 0x1d7   : > { %2522 = vpow2.f32 %v2266_v17  ;;  %v1927_v53 = vsel %vm1926_vm2, %v2519_v11, %v1923_v49 }
 0x1d8   : > { %2524 = vrcp.f32 %v1767_v48  ;;  %v1932_v4 = vsel %vm1929_vm3, %v1931_v34, %v1927_v53  ;;  %v1990_v25 = vand.u32 2147483648, %v1767_v48  ;;  %v1988_v52 = vand.u32 2147483647, %v1767_v48 }
 0x1d9   : > { %v2019_v12 = vmul.f32 %v1932_v4, %v1688_v61  ;;  %vm1984_vm5 = vweird.f32 %v1767_v48 }
 0x1da   : > { %v1991_v9 = vor.u32 1.1754944e-38, %v1990_v25  ;;  %vm1989_vm7 = vcmp.eq.f32.partialorder %v1988_v52, 8.507059e+37 }
 0x1db   : > { %2035 = vst [vmem:[%s2758_s27 + $0x50] sm:$0xff] %v2019_v12 }
 0x1dc   : > { %v1678_v7 = vpop.f32.mrf.mxu1 }
 0x1dd   : > { %v2523_v36 = vpop.eup %2522  ;;  %v4264_v50 = vadd.f32 %v4154_v40, %v1678_v7 }
 0x1de   : > { %v2525_v24 = vpop.eup %2524  ;;  %v1756_v31 = vadd.f32 1.0, %v2523_v36 }
 0x1df   : > { %v1980_v56 = vmul.f32 %v2525_v24, %v1767_v48  ;;  %v2270_v32 = vmul.f32 -1.442695, %v4264_v50  ;;  %vm1985_vm4 = vweird.f32 %v2525_v24 }
 0x1e0   : > { %2526 = vrcp.f32 %v1756_v31  ;;  %vm1986_vm6 = vmor %vm1984_vm5, %vm1985_vm4  ;;  %v1825_v46 = vand.u32 2147483648, %v1756_v31  ;;  %vm1819_vm8 = vweird.f32 %v1756_v31  ;;  %v1823_v63 = vand.u32 2147483647, %v1756_v31 }
 0x1e1   : > { %v1981_v5 = vsub.f32 1.0, %v1980_v56  ;;  %2528 = vpow2.f32 %v2270_v32 }
 0x1e2   : > { %v1826_v3 = vor.u32 1.1754944e-38, %v1825_v46  ;;  %vm1824_vm11 = vcmp.eq.f32.partialorder %v1823_v63, 8.507059e+37 }
 0x1e3   : > { %v1982_v39 = vmul.f32 %v2525_v24, %v1981_v5 }
 0x1e5   : > { %v1983_v29 = vadd.f32 %v2525_v24, %v1982_v39 }
 0x1e6   : > { %v2527_v62 = vpop.eup %2526 }
 0x1e7   : > { %v2529_v16 = vpop.eup %2528  ;;  %v1987_v10 = vsel %vm1986_vm6, %v2525_v24, %v1983_v29  ;;  %v1815_v14 = vmul.f32 %v2527_v62, %v1756_v31  ;;  %vm1820_vm9 = vweird.f32 %v2527_v62 }
 0x1e8   : > { %v1992_v44 = vsel %vm1989_vm7, %v1991_v9, %v1987_v10  ;;  %v1760_v57 = vadd.f32 1.0, %v2529_v16  ;;  %vm1821_vm10 = vmor %vm1819_vm8, %vm1820_vm9 }
 0x1e9   : > { %v2023_v54 = vmul.f32 %v1992_v44, %v1700_v51  ;;  %v1816_v8 = vsub.f32 1.0, %v1815_v14 }
 0x1ea   : > { %2530 = vrcp.f32 %v1760_v57  ;;  %v1885_v1 = vand.u32 2147483648, %v1760_v57  ;;  %vm1879_vm0 = vweird.f32 %v1760_v57  ;;  %v1883_v41 = vand.u32 2147483647, %v1760_v57 }
 0x1eb   : > { %2039 = vst [vmem:[%s2758_s27 + $0x70] sm:$0xff] %v2023_v54  ;;  %v1817_v15 = vmul.f32 %v2527_v62, %v1816_v8 }
 0x1ec   : > { %v1690_v27 = vpop.f32.mrf.mxu2  ;;  %v1886_v21 = vor.u32 1.1754944e-38, %v1885_v1  ;;  %vm1884_vm13 = vcmp.eq.f32.partialorder %v1883_v41, 8.507059e+37 }
 0x1ed   : > { %v1818_v43 = vadd.f32 %v2527_v62, %v1817_v15  ;;  %v1691_v6 = vadd.f32 %v4154_v40, %v1690_v27 }
 0x1ef   : > { %v1822_v22 = vsel %vm1821_vm10, %v2527_v62, %v1818_v43  ;;  %v2274_v47 = vmul.f32 -1.442695, %v1691_v6 }
 0x1f0   : > { %v2531_v55 = vpop.eup %2530  ;;  %v1827_v61 = vsel %vm1824_vm11, %v1826_v3, %v1822_v22 }
 0x1f1   : > { %v2012_v26 = vmul.f32 %v1827_v61, %v4259_v59  ;;  %v1875_v13 = vmul.f32 %v2531_v55, %v1760_v57  ;;  %2532 = vpow2.f32 %v2274_v47  ;;  %vm1880_vm12 = vweird.f32 %v2531_v55 }
 0x1f2   : > { %vm1881_vm1 = vmor %vm1879_vm0, %vm1880_vm12 }
 0x1f3   : > { %2028 = vst [vmem:[%s2758_s27 + $0x18] sm:$0xff] %v2012_v26  ;;  %v1876_v42 = vsub.f32 1.0, %v1875_v13 }
 0x1f5   : > { %v1877_v33 = vmul.f32 %v2531_v55, %v1876_v42 }
 0x1f7   : > { %v2533_v2 = vpop.eup %2532  ;;  %v1878_v18 = vadd.f32 %v2531_v55, %v1877_v33 }
 0x1f8   : > { %v1764_v60 = vadd.f32 1.0, %v2533_v2 }
 0x1f9   : > { %v1702_v28 = vpop.f32.mrf.mxu3  ;;  %v1882_v30 = vsel %vm1881_vm1, %v2531_v55, %v1878_v18 }
 0x1fa   : > { %v1703_v38 = vadd.f32 %v4154_v40, %v1702_v28  ;;  %v1887_v51 = vsel %vm1884_vm13, %v1886_v21, %v1882_v30  ;;  %2534 = vrcp.f32 %v1764_v60  ;;  %v1945_v19 = vand.u32 2147483648, %v1764_v60 }
 0x1fb   : > { %v2016_v23 = vmul.f32 %v1887_v51, %v4264_v50  ;;  %v1943_v35 = vand.u32 2147483647, %v1764_v60  ;;  %vm1939_vm15 = vweird.f32 %v1764_v60 }
 0x1fc   : > { %v2278_v11 = vmul.f32 -1.442695, %v1703_v38  ;;  %v1946_v17 = vor.u32 1.1754944e-38, %v1945_v19 }
 0x1fd   : > { %2032 = vst [vmem:[%s2758_s27 + $0x38] sm:$0xff] %v2016_v23  ;;  %vm1944_vm3 = vcmp.eq.f32.partialorder %v1943_v35, 8.507059e+37 }
 0x1fe   : > { %2536 = vpow2.f32 %v2278_v11 }
 0x200   : > { %v2535_v37 = vpop.eup %2534 }
 0x201   : > { %v1935_v0 = vmul.f32 %v2535_v37, %v1764_v60  ;;  %vm1940_vm14 = vweird.f32 %v2535_v37 }
 0x202   : > { %vm1941_vm2 = vmor %vm1939_vm15, %vm1940_vm14 }
 0x203   : > { %v1936_v59 = vsub.f32 1.0, %v1935_v0 }
 0x204   : > { %v2537_v45 = vpop.eup %2536 }
 0x205   : > { %v1768_v58 = vadd.f32 1.0, %v2537_v45  ;;  %v1937_v20 = vmul.f32 %v2535_v37, %v1936_v59 }
 0x207   : > { %2538 = vrcp.f32 %v1768_v58  ;;  %v1938_v40 = vadd.f32 %v2535_v37, %v1937_v20  ;;  %v2005_v7 = vand.u32 2147483648, %v1768_v58  ;;  %v2003_v50 = vand.u32 2147483647, %v1768_v58 }
 0x208   : > { %vm1999_vm5 = vweird.f32 %v1768_v58 }
 0x209   : > { %v1942_v48 = vsel %vm1941_vm2, %v2535_v37, %v1938_v40  ;;  %v2006_v31 = vor.u32 1.1754944e-38, %v2005_v7  ;;  %vm2004_vm7 = vcmp.eq.f32.partialorder %v2003_v50, 8.507059e+37 }
 0x20a   : > { %v1947_v49 = vsel %vm1944_vm3, %v1946_v17, %v1942_v48 }
 0x20b   : > { %v2020_v34 = vmul.f32 %v1947_v49, %v1691_v6 }
 0x20d   : > { %v2539_v53 = vpop.eup %2538  ;;  %2036 = vst [vmem:[%s2758_s27 + $0x58] sm:$0xff] %v2020_v34 }
 0x20e   : > { %v1995_v4 = vmul.f32 %v2539_v53, %v1768_v58  ;;  %vm2000_vm4 = vweird.f32 %v2539_v53 }
 0x20f   : > { %vm2001_vm6 = vmor %vm1999_vm5, %vm2000_vm4 }
 0x210   : > { %v1996_v12 = vsub.f32 1.0, %v1995_v4 }
 0x212   : > { %v1997_v36 = vmul.f32 %v2539_v53, %v1996_v12 }
 0x214   : > { %v1998_v24 = vadd.f32 %v2539_v53, %v1997_v36 }
 0x216   : > { %v2002_v56 = vsel %vm2001_vm6, %v2539_v53, %v1998_v24 }
 0x217   : > { %v2007_v32 = vsel %vm2004_vm7, %v2006_v31, %v2002_v56 }
 0x218   : > { %v2024_v5 = vmul.f32 %v2007_v32, %v1703_v38 }
 0x21a   : > { %2040 = vst [vmem:[%s2758_s27 + $0x78] sm:$0xff] %v2024_v5 }
 0x21b   : > { %2576 = shalt.err (!%p2573_p12)
}
 0x21c   : > { %s2647_s27 = smov 128   ;;  %s2648_s28 = smov 8  }
 0x21d   : > { %2337 = dma.vmem_to_hbm [thread:$0]  (%p2730_p3), %s2058_s21, 2048, %s2060_s22, %s2042_s16, %s2647_s27, %s2647_s27, %s2648_s28  }
 0x21e PF: > { %p2343_p13 = scmp.ge.s32.totalorder %s2645_s25, 2  ;;  %s2074_s29 = sand.u32 1, %s2617_s18  }
 0x21f   : > { %s2075_s12 = scalar_lea.sflag [#allocation5], %s2074_s29 }
 0x220   : > { %p2340_p0 = pnand %p2343_p13, %p2739_p8 }
 0x222   : > { %p2341_p1 = pneg %p2340_p0 }
 0x224   : > { %2612 = dma.done.wait (%p2341_p1), %s2075_s12, 2048  }
 0x225   : > { %2614 = vsyncadd (%p2341_p1), %s2075_s12, 4294965248  ;;  %s18_s25 = sadd.s32 1, %s2645_s25   ;;  %s4549_s6 = sld [smem:[#allocation10_spill]] }
 0x226   : > { %p15_p2 = scmp.ge.s32.totalorder %s18_s25, 6   ;;  %s4550_s14 = sld [smem:[#allocation11_spill]] }
 0x227   : > { %s4551_s18 = smov %s2621_s19  ;;  %s4552_s19 = smov %s2625_s20 }
 0x228   : > { %s4553_s20 = smov %s2748_s11  ;;  %s4554_s21 = smov %s2637_s23 }
 0x229   : > { %s4555_s22 = smov %s2641_s24  ;;  %17 = sbr.rel (!%p15_p2) target bundleno = 5 (0x5), region = 149 }
 0x22b   : > { %s4556_s23 = smov %s4549_s6 }
 0x22c   : > { %s4557_s24 = smov %s4550_s14 }
 0x22e   :  { %2081 = vsyncpa [#allocation5], 1 }
 0x22f   :  { %2083 = vsyncpa [#allocation5 + $0x1], 1 }
 0x230   :  { %2084 = vsyncmov [#allocation3] }
 0x233   :  { %s2085_s7 = vpop.sfrf %2084 }
 0x234   :  { %p2286_p3 = scmp.ne.s32.totalorder %s2085_s7, 0 }
 0x236   :  { %2089 = shalt.err (%p2286_p3)  }
 0x237   :  { %2091 = vsyncmov [#allocation3 + $0x1] }
 0x23a   :  { %s2092_s15 = vpop.sfrf %2091 }
 0x23b   :  { %p2287_p8 = scmp.ne.s32.totalorder %s2092_s15, 0 }
 0x23d   :  { %2096 = shalt.err (%p2287_p8)  }

</bundles_post_ra>
